<compile_context>
chip_gen: v7x
topology: tpu7x:2x2x1
jax: 0.10.0
libtpu: 0.0.40
codegen_flags: <defaults>
</compile_context>

<pallas_src>
import numpy as np
import jax
import jax.numpy as jnp
from jax.experimental import pallas as pl
from jax.experimental.pallas import tpu as pltpu

# ----------------------------- static network config -------------------------
LAYERS = [
    dict(type='convolutional', bn=1, filters=8,  size=3, stride=1, pad=1, activation='leaky'),   # 0
    dict(type='convolutional', bn=1, filters=16, size=3, stride=2, pad=1, activation='leaky'),   # 1
    dict(type='convolutional', bn=1, filters=8,  size=1, stride=1, pad=1, activation='leaky'),   # 2
    dict(type='convolutional', bn=1, filters=16, size=3, stride=1, pad=1, activation='leaky'),   # 3
    dict(type='shortcut', frm=-3),                                                               # 4
    dict(type='convolutional', bn=0, filters=18, size=1, stride=1, pad=1, activation='linear'),  # 5
    dict(type='yolo'),                                                                           # 6
    dict(type='route', layers='4'),                                                              # 7
    dict(type='convolutional', bn=1, filters=8,  size=1, stride=1, pad=1, activation='leaky'),   # 8
    dict(type='upsample'),                                                                       # 9
    dict(type='convolutional', bn=1, filters=16, size=3, stride=2, pad=1, activation='leaky'),   # 10
    dict(type='convolutional', bn=0, filters=18, size=1, stride=1, pad=1, activation='linear'),  # 11
    dict(type='yolo'),                                                                           # 12
]

H = W = 16          # input spatial size
HD = WD = H // 2    # detection-head resolution
C_IN = 3
DET_C = 18
PACK_COLS = 144     # widest block (Wd*18) -> every packed block padded to 144 cols

_VMEM = pl.BlockSpec(memory_space=pltpu.MemorySpace.VMEM)

# rows (within the 'VECS' block) of the tiled per-channel vectors
VEC_ROW = dict(g0=0, b0=1, g1=2, b1=3, g2=4, b2=5, g3=6, b3=7,
               bias5=8, g8=9, b8=10, g10=11, b10=12, bias11=13)


# ------------------------- host-side constant builders -----------------------
def _toeplitz_w(w_oikk, wi, wo, col_of, h_groups):
    """Per-H-group block-Toeplitz matrices for a 3x3 conv on (rows, W*Cin) slabs.

    w_oikk : (Cout, Cin, 3, 3) weights.
    col_of(r, kw) -> input column (out-of-range => zero padding along W).
    h_groups[kh]  -> which output matrix tap kh accumulates into.
    Returns list of (wi*Cin, wo*Cout) f32 matrices.
    """
    cout, cin, K, _ = w_oikk.shape
    mats = [np.zeros((wi * cin, wo * cout), np.float32) for _ in range(max(h_groups) + 1)]
    for kh in range(K):
        T = mats[h_groups[kh]]
        for kw in range(K):
            blk = np.asarray(w_oikk[:, :, kh, kw].T, np.float32)          # (Cin, Cout)
            for r in range(wo):
                w = col_of(r, kw)
                if 0 <= w < wi:
                    T[w * cin:(w + 1) * cin, r * cout:(r + 1) * cout] += blk
    return mats


def _blockdiag_w(w_oi, wo):
    """1x1 conv on a lane-dense (rows, W*Cin) slab -> block-diag (W*Cin, W*Cout)."""
    cout, cin = w_oi.shape
    T = np.zeros((wo * cin, wo * cout), np.float32)
    for r in range(wo):
        T[r * cin:(r + 1) * cin, r * cout:(r + 1) * cout] = w_oi.T
    return T


def _group_mean(wo, c):
    """(wo*c, wo*c) matrix averaging lanes over the wo column-groups per channel."""
    return np.kron(np.full((wo, wo), 1.0 / wo, np.float32),
                   np.eye(c, dtype=np.float32)).astype(np.float32)


def _row_select(n, ho, hin, h_of_q):
    """0/1 (n*ho, n*hin) matrix selecting input row h_of_q(q) per image; out-of-range
    rows are all-zero (realizes the conv's zero padding along H)."""
    S = np.zeros((n * ho, n * hin), np.float32)
    for b in range(n):
        for q in range(ho):
            h = h_of_q(q)
            if 0 <= h < hin:
                S[b * ho + q, b * hin + h] = 1.0
    return S


def _tile_vec(v, reps):
    """Per-channel vector tiled across the W column-groups, zero-padded to PACK_COLS."""
    row = np.zeros((1, PACK_COLS), np.float32)
    t = np.tile(np.asarray(v, np.float32), reps)
    row[0, :t.size] = t
    return row


def _pack(entries):
    """Stack (name, matrix) blocks into one (rows, PACK_COLS) slab; 8-aligned offsets."""
    slots, blocks, off = {}, [], 0
    for name, m in entries:
        r, c = m.shape
        assert r % 8 == 0 and c <= PACK_COLS, (name, m.shape)
        blk = np.zeros((r, PACK_COLS), np.float32)
        blk[:, :c] = m
        slots[name] = (off, r, c)
        blocks.append(blk)
        off += r
    return np.concatenate(blocks, axis=0), slots


# ------------------------------ parameter init -------------------------------
def init_raw_params(key):
    """Deterministic per-layer weights in PyTorch layout (OIHW, gamma/beta/bias)."""
    params, out_filters, filters = {}, [], C_IN
    for idx, blk in enumerate(LAYERS):
        if blk['type'] == 'convolutional':
            cin = out_filters[-1] if out_filters else C_IN
            cout, K = blk['filters'], blk['size']
            key, kw_, kg, kb = jax.random.split(key, 4)
            wgt = jax.random.normal(kw_, (cout, cin, K, K), jnp.float32) * ((cin * K * K) ** -0.5)
            p = {'w': np.asarray(wgt, np.float32)}
            if blk['bn']:
                p['gamma'] = np.asarray(1.0 + 0.1 * jax.random.normal(kg, (cout,), jnp.float32), np.float32)
                p['beta'] = np.asarray(0.1 * jax.random.normal(kb, (cout,), jnp.float32), np.float32)
            else:
                p['bias'] = np.asarray(0.1 * jax.random.normal(kg, (cout,), jnp.float32), np.float32)
            params[idx] = p
            filters = cout
        elif blk['type'] == 'route':
            filters = sum(out_filters[int(l)] for l in blk['layers'].split(','))
        # shortcut / upsample / yolo keep the previous filter count
        out_filters.append(filters)
    return params


def pack_params(raw, n_batch):
    """Build every constant matrix (Toeplitz / block-diag / BN-averaging / row-select /
    tiled vectors) host-side and pack into a single f32 slab."""
    std = lambda s: (lambda r, kw: s * r + kw - 1)        # 3x3, pad 1, stride s
    up_col = lambda r, kw: r + min(kw, 1) - 1              # upsample-folded columns r-1, r, r

    T0 = _toeplitz_w(raw[0]['w'], W, W, std(1), [0, 1, 2])      # 3 x (48, 128)
    T1 = _toeplitz_w(raw[1]['w'], W, WD, std(2), [0, 1, 2])     # 3 x (128, 128)
    T3 = _toeplitz_w(raw[3]['w'], WD, WD, std(1), [0, 1, 2])    # 3 x (64, 128)
    T10 = _toeplitz_w(raw[10]['w'], WD, WD, up_col, [0, 1, 1])  # 2 x (64, 128)  (rows q-1 | q,q)

    BD2 = _blockdiag_w(raw[2]['w'][:, :, 0, 0], WD)    # (128, 64)
    BD5 = _blockdiag_w(raw[5]['w'][:, :, 0, 0], WD)    # (128, 144)
    BD8 = _blockdiag_w(raw[8]['w'][:, :, 0, 0], WD)    # (128, 64)
    BD11 = _blockdiag_w(raw[11]['w'][:, :, 0, 0], WD)  # (128, 144)

    Pa = _group_mean(W, 8)     # (128,128)  layer 0 BN
    Pb = _group_mean(WD, 16)   # (128,128)  layers 1/3/10 BN
    Pc = _group_mean(WD, 8)    # (64,64)    layers 2/8 BN

    # H-tap row selection (also realizes H zero-padding and the stride-2 row drop).
    S_DN16 = _row_select(n_batch, H, H, lambda q: q - 1)
    S_UP16 = _row_select(n_batch, H, H, lambda q: q + 1)
    S2_0 = _row_select(n_batch, HD, H, lambda q: 2 * q - 1)
    S2_1 = _row_select(n_batch, HD, H, lambda q: 2 * q)
    S2_2 = _row_select(n_batch, HD, H, lambda q: 2 * q + 1)
    S_DN8 = _row_select(n_batch, HD, HD, lambda q: q - 1)
    S_UP8 = _row_select(n_batch, HD, HD, lambda q: q + 1)

    vec_rows = [
        _tile_vec(raw[0]['gamma'], W), _tile_vec(raw[0]['beta'], W),
        _tile_vec(raw[1]['gamma'], WD), _tile_vec(raw[1]['beta'], WD),
        _tile_vec(raw[2]['gamma'], WD), _tile_vec(raw[2]['beta'], WD),
        _tile_vec(raw[3]['gamma'], WD), _tile_vec(raw[3]['beta'], WD),
        _tile_vec(raw[5]['bias'], WD),
        _tile_vec(raw[8]['gamma'], WD), _tile_vec(raw[8]['beta'], WD),
        _tile_vec(raw[10]['gamma'], WD), _tile_vec(raw[10]['beta'], WD),
        _tile_vec(raw[11]['bias'], WD),
        np.zeros((1, PACK_COLS), np.float32), np.zeros((1, PACK_COLS), np.float32),
    ]
    VECS = np.concatenate(vec_rows, axis=0)   # (16, 144)

    entries = [
        ('T0_0', T0[0]), ('T0_1', T0[1]), ('T0_2', T0[2]),
        ('T1_0', T1[0]), ('T1_1', T1[1]), ('T1_2', T1[2]),
        ('T3_0', T3[0]), ('T3_1', T3[1]), ('T3_2', T3[2]),
        ('T10_0', T10[0]), ('T10_1', T10[1]),
        ('BD2', BD2), ('BD5', BD5), ('BD8', BD8), ('BD11', BD11),
        ('P_W16C8', Pa), ('P_W8C16', Pb), ('P_W8C8', Pc),
        ('S_DN16', S_DN16), ('S_UP16', S_UP16),
        ('S2_0', S2_0), ('S2_1', S2_1), ('S2_2', S2_2),
        ('S_DN8', S_DN8), ('S_UP8', S_UP8),
        ('VECS', VECS),
    ]
    wpk, slots = _pack(entries)
    return jnp.asarray(wpk), slots


# ------------------------------- fused kernel --------------------------------
def make_darknet_forward(slots):
    def kernel(x_ref, wpk_ref, o0_ref, o1_ref):
        def blk(name):
            off, r, c = slots[name]
            return wpk_ref[off:off + r, :c]          # static slice of the packed slab

        def vec(name, c):
            off = slots['VECS'][0] + VEC_ROW[name]
            return wpk_ref[off:off + 1, :c]          # (1, c) row

        def mm(a, b):
            return jnp.dot(a, b, preferred_element_type=jnp.float32)

        def bn_leaky(acc, p_name, gname, bname):
            # train-mode BatchNorm2d (batch stats, biased var, eps=1e-5) + LeakyReLU(0.1)
            L = acc.shape[-1]
            P = blk(p_name)                                   # lane group -> channel averaging
            mu = jnp.mean(acc, axis=0, keepdims=True)         # (1, L) per-lane mean over rows
            m2 = jnp.mean(acc * acc, axis=0, keepdims=True)   # (1, L) per-lane E[x^2]
            mean = mm(mu, P)                                  # per-channel mean, tiled over W
            var = mm(m2, P) - mean * mean                     # biased batch variance
            scale = vec(gname, L) * jax.lax.rsqrt(var + 1e-5)
            y = acc * scale + (vec(bname, L) - mean * scale)
            return jnp.where(y > 0.0, y, 0.1 * y)

        def conv3x3(a, taps):
            # taps: list of (row_select_name_or_None, toeplitz_name); None == identity tap
            acc = None
            for s_name, t_name in taps:
                rows = a if s_name is None else mm(blk(s_name), a)
                term = mm(rows, blk(t_name))
                acc = term if acc is None else acc + term
            return acc

        x = x_ref[...]                                        # (N*16, 16*3) lane = w*3+c

        # L0: 3x3 s1 p1, 3->8, BN+leaky                       -> (N*16, 16*8 = 128)
        a0 = bn_leaky(conv3x3(x, [('S_DN16', 'T0_0'), (None, 'T0_1'), ('S_UP16', 'T0_2')]),
                      'P_W16C8', 'g0', 'b0')
        # L1: 3x3 s2 p1, 8->16, BN+leaky                      -> (N*8, 8*16 = 128)
        a1 = bn_leaky(conv3x3(a0, [('S2_0', 'T1_0'), ('S2_1', 'T1_1'), ('S2_2', 'T1_2')]),
                      'P_W8C16', 'g1', 'b1')
        # L2: 1x1, 16->8, BN+leaky                            -> (N*8, 64)
        a2 = bn_leaky(mm(a1, blk('BD2')), 'P_W8C8', 'g2', 'b2')
        # L3: 3x3 s1 p1, 8->16, BN+leaky                      -> (N*8, 128)
        a3 = bn_leaky(conv3x3(a2, [('S_DN8', 'T3_0'), (None, 'T3_1'), ('S_UP8', 'T3_2')]),
                      'P_W8C16', 'g3', 'b3')
        # L4: shortcut from=-3  ->  outputs[3] + outputs[1]
        a4 = a3 + a1
        # L5/L6: 1x1 + bias (linear) -> first yolo head       -> (N*8, 8*18 = 144)
        o0_ref[...] = mm(a4, blk('BD5')) + vec('bias5', 144)
        # L7: route '4' -> a4 ; L8: 1x1, 16->8, BN+leaky
        a8 = bn_leaky(mm(a4, blk('BD8')), 'P_W8C8', 'g8', 'b8')
        # L9+L10: nearest 2x upsample folded into the 3x3 s2 p1 conv (rows q-1 | q,q; cols r-1,r,r)
        a10 = bn_leaky(conv3x3(a8, [('S_DN8', 'T10_0'), (None, 'T10_1')]),
                       'P_W8C16', 'g10', 'b10')
        # L11/L12: 1x1 + bias -> second yolo head
        o1_ref[...] = mm(a10, blk('BD11')) + vec('bias11', 144)

    def forward(x_nchw, wpk):
        n = x_nchw.shape[0]
        # NCHW -> lane-dense (N*H, W*Cin) slab at the boundary (tiny XLA glue)
        x2d = jnp.transpose(x_nchw, (0, 2, 3, 1)).reshape(n * H, W * C_IN)
        det0, det1 = pl.pallas_call(
            kernel,
            out_shape=(jax.ShapeDtypeStruct((n * HD, WD * DET_C), jnp.float32),
                       jax.ShapeDtypeStruct((n * HD, WD * DET_C), jnp.float32)),
            in_specs=[_VMEM, _VMEM],
            out_specs=(_VMEM, _VMEM),
        )(x2d, wpk)

        def to_nchw(d):   # (N*Hd, Wd*18) -> (N, 18, Hd, Wd)
            return d.reshape(n, HD, WD, DET_C).transpose(0, 3, 1, 2)

        # torch.cat((det0, det1), dim=1) of the two yolo heads (done wrapper-side; 18 KB)
        return jnp.concatenate([to_nchw(det0), to_nchw(det1)], axis=1)

    return forward


# --------------------------- pure-JAX reference check ------------------------
def _ref_forward(x, raw):
    def conv(inp, wt, stride, pad):
        return jax.lax.conv_general_dilated(
            inp, jnp.asarray(wt), (stride, stride), [(pad, pad), (pad, pad)],
            dimension_numbers=('NCHW', 'OIHW', 'NCHW'),
            precision=jax.lax.Precision.HIGHEST)

    def bn_leaky(v, gamma, beta):
        g = jnp.asarray(gamma).reshape(1, -1, 1, 1)
        b = jnp.asarray(beta).reshape(1, -1, 1, 1)
        mean = jnp.mean(v, axis=(0, 2, 3), keepdims=True)
        var = jnp.mean((v - mean) ** 2, axis=(0, 2, 3), keepdims=True)
        y = (v - mean) * jax.lax.rsqrt(var + 1e-5) * g + b
        return jnp.where(y > 0, y, 0.1 * y)

    a0 = bn_leaky(conv(x, raw[0]['w'], 1, 1), raw[0]['gamma'], raw[0]['beta'])
    a1 = bn_leaky(conv(a0, raw[1]['w'], 2, 1), raw[1]['gamma'], raw[1]['beta'])
    a2 = bn_leaky(conv(a1, raw[2]['w'], 1, 0), raw[2]['gamma'], raw[2]['beta'])
    a3 = bn_leaky(conv(a2, raw[3]['w'], 1, 1), raw[3]['gamma'], raw[3]['beta'])
    a4 = a3 + a1
    det0 = conv(a4, raw[5]['w'], 1, 0) + jnp.asarray(raw[5]['bias']).reshape(1, -1, 1, 1)
    a8 = bn_leaky(conv(a4, raw[8]['w'], 1, 0), raw[8]['gamma'], raw[8]['beta'])
    up = jnp.repeat(jnp.repeat(a8, 2, axis=2), 2, axis=3)          # nearest 2x upsample
    a10 = bn_leaky(conv(up, raw[10]['w'], 2, 1), raw[10]['gamma'], raw[10]['beta'])
    det1 = conv(a10, raw[11]['w'], 1, 0) + jnp.asarray(raw[11]['bias']).reshape(1, -1, 1, 1)
    return jnp.concatenate([det0, det1], axis=1)


# ----------------------------------- main -------------------------------------
if __name__ == "__main__":
    key = jax.random.PRNGKey(0)
    kx, kp = jax.random.split(key)
    x = jax.random.normal(kx, (2, C_IN, H, W), jnp.float32)        # NCHW, like PyTorch input

    raw = init_raw_params(kp)
    wpk, slots = pack_params(raw, n_batch=2)

    fwd = jax.jit(make_darknet_forward(slots))
    out = jax.block_until_ready(fwd(x, wpk))
    assert out.shape == (2, 2 * DET_C, HD, WD), out.shape          # (2, 36, 8, 8)

    ref = jax.block_until_ready(jax.jit(lambda xx: _ref_forward(xx, raw))(x))
    err = float(jnp.max(jnp.abs(out - ref)))
    assert err < 2e-3, f"max abs err vs reference: {err}"
    print("KERNEL_OK")
</pallas_src>

<mosaic_0001>
module attributes {stable_mosaic.version = 11 : i64} {
  func.func @kernel(%arg0: memref<32x48xf32, #tpu.memory_space<vmem>>, %arg1: memref<1840x144xf32, #tpu.memory_space<vmem>>, %arg2: memref<16x144xf32, #tpu.memory_space<vmem>>, %arg3: memref<16x144xf32, #tpu.memory_space<vmem>>) attributes {dimension_semantics = [], scalar_prefetch = 0 : i64, scratch_operands = 0 : i64, tpu.core_type = #tpu.core_type<tc>} {
    %c0 = arith.constant 0 : index
    %c0_0 = arith.constant 0 : index
    %0 = vector.load %arg0[%c0, %c0_0] : memref<32x48xf32, #tpu.memory_space<vmem>>, vector<32x48xf32>
    %c1680 = arith.constant 1680 : index
    %c0_1 = arith.constant 0 : index
    %1 = vector.load %arg1[%c1680, %c0_1] : memref<1840x144xf32, #tpu.memory_space<vmem>>, vector<32x32xf32>
    %cst = arith.constant dense<0.000000e+00> : vector<32x48xf32>
    %2 = tpu.matmul %1, %0, %cst {dimension_numbers = #tpu.dot_dimension_numbers<[1], [0], [0], [1], [0, 0, 1, 1], [], []>} : vector<32x32xf32>, vector<32x48xf32>, vector<32x48xf32> -> vector<32x48xf32>
    %c0_2 = arith.constant 0 : index
    %c0_3 = arith.constant 0 : index
    %3 = vector.load %arg1[%c0_2, %c0_3] : memref<1840x144xf32, #tpu.memory_space<vmem>>, vector<48x128xf32>
    %cst_4 = arith.constant dense<0.000000e+00> : vector<32x128xf32>
    %4 = tpu.matmul %2, %3, %cst_4 {dimension_numbers = #tpu.dot_dimension_numbers<[1], [0], [0], [1], [0, 0, 1, 1], [], []>} : vector<32x48xf32>, vector<48x128xf32>, vector<32x128xf32> -> vector<32x128xf32>
    %c48 = arith.constant 48 : index
    %c0_5 = arith.constant 0 : index
    %5 = vector.load %arg1[%c48, %c0_5] : memref<1840x144xf32, #tpu.memory_space<vmem>>, vector<48x128xf32>
    %cst_6 = arith.constant dense<0.000000e+00> : vector<32x128xf32>
    %6 = tpu.matmul %0, %5, %cst_6 {dimension_numbers = #tpu.dot_dimension_numbers<[1], [0], [0], [1], [0, 0, 1, 1], [], []>} : vector<32x48xf32>, vector<48x128xf32>, vector<32x128xf32> -> vector<32x128xf32>
    %7 = arith.addf %4, %6 : vector<32x128xf32>
    %c1712 = arith.constant 1712 : index
    %c0_7 = arith.constant 0 : index
    %8 = vector.load %arg1[%c1712, %c0_7] : memref<1840x144xf32, #tpu.memory_space<vmem>>, vector<32x32xf32>
    %cst_8 = arith.constant dense<0.000000e+00> : vector<32x48xf32>
    %9 = tpu.matmul %8, %0, %cst_8 {dimension_numbers = #tpu.dot_dimension_numbers<[1], [0], [0], [1], [0, 0, 1, 1], [], []>} : vector<32x32xf32>, vector<32x48xf32>, vector<32x48xf32> -> vector<32x48xf32>
    %c96 = arith.constant 96 : index
    %c0_9 = arith.constant 0 : index
    %10 = vector.load %arg1[%c96, %c0_9] : memref<1840x144xf32, #tpu.memory_space<vmem>>, vector<48x128xf32>
    %cst_10 = arith.constant dense<0.000000e+00> : vector<32x128xf32>
    %11 = tpu.matmul %9, %10, %cst_10 {dimension_numbers = #tpu.dot_dimension_numbers<[1], [0], [0], [1], [0, 0, 1, 1], [], []>} : vector<32x48xf32>, vector<48x128xf32>, vector<32x128xf32> -> vector<32x128xf32>
    %12 = arith.addf %7, %11 : vector<32x128xf32>
    %c1360 = arith.constant 1360 : index
    %c0_11 = arith.constant 0 : index
    %13 = vector.load %arg1[%c1360, %c0_11] : memref<1840x144xf32, #tpu.memory_space<vmem>>, vector<128x128xf32>
    %cst_12 = arith.constant dense<0.000000e+00> : vector<128xf32>
    %14 = vector.multi_reduction <add>, %12, %cst_12 [0] : vector<32x128xf32> to vector<128xf32>
    %15 = vector.shape_cast %14 : vector<128xf32> to vector<1x128xf32>
    %cst_13 = arith.constant 3.200000e+01 : f32
    %16 = vector.broadcast %cst_13 : f32 to vector<1x128xf32>
    %17 = arith.divf %15, %16 : vector<1x128xf32>
    %18 = arith.mulf %12, %12 : vector<32x128xf32>
    %cst_14 = arith.constant dense<0.000000e+00> : vector<128xf32>
    %19 = vector.multi_reduction <add>, %18, %cst_14 [0] : vector<32x128xf32> to vector<128xf32>
    %20 = vector.shape_cast %19 : vector<128xf32> to vector<1x128xf32>
    %cst_15 = arith.constant 3.200000e+01 : f32
    %21 = vector.broadcast %cst_15 : f32 to vector<1x128xf32>
    %22 = arith.divf %20, %21 : vector<1x128xf32>
    %cst_16 = arith.constant dense<0.000000e+00> : vector<1x128xf32>
    %23 = tpu.matmul %17, %13, %cst_16 {dimension_numbers = #tpu.dot_dimension_numbers<[1], [0], [0], [1], [0, 0, 1, 1], [], []>} : vector<1x128xf32>, vector<128x128xf32>, vector<1x128xf32> -> vector<1x128xf32>
    %cst_17 = arith.constant dense<0.000000e+00> : vector<1x128xf32>
    %24 = tpu.matmul %22, %13, %cst_17 {dimension_numbers = #tpu.dot_dimension_numbers<[1], [0], [0], [1], [0, 0, 1, 1], [], []>} : vector<1x128xf32>, vector<128x128xf32>, vector<1x128xf32> -> vector<1x128xf32>
    %25 = arith.mulf %23, %23 : vector<1x128xf32>
    %26 = arith.subf %24, %25 : vector<1x128xf32>
    %c1824 = arith.constant 1824 : index
    %c0_18 = arith.constant 0 : index
    %27 = vector.load %arg1[%c1824, %c0_18] : memref<1840x144xf32, #tpu.memory_space<vmem>>, vector<1x128xf32>
    %cst_19 = arith.constant 9.99999974E-6 : f32
    %28 = vector.broadcast %cst_19 : f32 to vector<1x128xf32>
    %29 = arith.addf %26, %28 : vector<1x128xf32>
    %30 = math.rsqrt %29 : vector<1x128xf32>
    %31 = arith.mulf %27, %30 : vector<1x128xf32>
    %32 = vector.broadcast %31 : vector<1x128xf32> to vector<32x128xf32>
    %33 = arith.mulf %12, %32 : vector<32x128xf32>
    %c1825 = arith.constant 1825 : index
    %c0_20 = arith.constant 0 : index
    %34 = vector.load %arg1[%c1825, %c0_20] : memref<1840x144xf32, #tpu.memory_space<vmem>>, vector<1x128xf32>
    %35 = arith.mulf %23, %31 : vector<1x128xf32>
    %36 = arith.subf %34, %35 : vector<1x128xf32>
    %37 = vector.broadcast %36 : vector<1x128xf32> to vector<32x128xf32>
    %38 = arith.addf %33, %37 : vector<32x128xf32>
    %cst_21 = arith.constant 0.000000e+00 : f32
    %39 = vector.broadcast %cst_21 : f32 to vector<32x128xf32>
    %40 = arith.cmpf ogt, %38, %39 : vector<32x128xf32>
    %cst_22 = arith.constant 1.000000e-01 : f32
    %41 = vector.broadcast %cst_22 : f32 to vector<32x128xf32>
    %42 = arith.mulf %41, %38 : vector<32x128xf32>
    %43 = arith.select %40, %38, %42 : vector<32x128xi1>, vector<32x128xf32>
    %c1744 = arith.constant 1744 : index
    %c0_23 = arith.constant 0 : index
    %44 = vector.load %arg1[%c1744, %c0_23] : memref<1840x144xf32, #tpu.memory_space<vmem>>, vector<16x32xf32>
    %cst_24 = arith.constant dense<0.000000e+00> : vector<16x128xf32>
    %45 = tpu.matmul %44, %43, %cst_24 {dimension_numbers = #tpu.dot_dimension_numbers<[1], [0], [0], [1], [0, 0, 1, 1], [], []>} : vector<16x32xf32>, vector<32x128xf32>, vector<16x128xf32> -> vector<16x128xf32>
    %c144 = arith.constant 144 : index
    %c0_25 = arith.constant 0 : index
    %46 = vector.load %arg1[%c144, %c0_25] : memref<1840x144xf32, #tpu.memory_space<vmem>>, vector<128x128xf32>
    %cst_26 = arith.constant dense<0.000000e+00> : vector<16x128xf32>
    %47 = tpu.matmul %45, %46, %cst_26 {dimension_numbers = #tpu.dot_dimension_numbers<[1], [0], [0], [1], [0, 0, 1, 1], [], []>} : vector<16x128xf32>, vector<128x128xf32>, vector<16x128xf32> -> vector<16x128xf32>
    %c1760 = arith.constant 1760 : index
    %c0_27 = arith.constant 0 : index
    %48 = vector.load %arg1[%c1760, %c0_27] : memref<1840x144xf32, #tpu.memory_space<vmem>>, vector<16x32xf32>
    %cst_28 = arith.constant dense<0.000000e+00> : vector<16x128xf32>
    %49 = tpu.matmul %48, %43, %cst_28 {dimension_numbers = #tpu.dot_dimension_numbers<[1], [0], [0], [1], [0, 0, 1, 1], [], []>} : vector<16x32xf32>, vector<32x128xf32>, vector<16x128xf32> -> vector<16x128xf32>
    %c272 = arith.constant 272 : index
    %c0_29 = arith.constant 0 : index
    %50 = vector.load %arg1[%c272, %c0_29] : memref<1840x144xf32, #tpu.memory_space<vmem>>, vector<128x128xf32>
    %cst_30 = arith.constant dense<0.000000e+00> : vector<16x128xf32>
    %51 = tpu.matmul %49, %50, %cst_30 {dimension_numbers = #tpu.dot_dimension_numbers<[1], [0], [0], [1], [0, 0, 1, 1], [], []>} : vector<16x128xf32>, vector<128x128xf32>, vector<16x128xf32> -> vector<16x128xf32>
    %52 = arith.addf %47, %51 : vector<16x128xf32>
    %c1776 = arith.constant 1776 : index
    %c0_31 = arith.constant 0 : index
    %53 = vector.load %arg1[%c1776, %c0_31] : memref<1840x144xf32, #tpu.memory_space<vmem>>, vector<16x32xf32>
    %cst_32 = arith.constant dense<0.000000e+00> : vector<16x128xf32>
    %54 = tpu.matmul %53, %43, %cst_32 {dimension_numbers = #tpu.dot_dimension_numbers<[1], [0], [0], [1], [0, 0, 1, 1], [], []>} : vector<16x32xf32>, vector<32x128xf32>, vector<16x128xf32> -> vector<16x128xf32>
    %c400 = arith.constant 400 : index
    %c0_33 = arith.constant 0 : index
    %55 = vector.load %arg1[%c400, %c0_33] : memref<1840x144xf32, #tpu.memory_space<vmem>>, vector<128x128xf32>
    %cst_34 = arith.constant dense<0.000000e+00> : vector<16x128xf32>
    %56 = tpu.matmul %54, %55, %cst_34 {dimension_numbers = #tpu.dot_dimension_numbers<[1], [0], [0], [1], [0, 0, 1, 1], [], []>} : vector<16x128xf32>, vector<128x128xf32>, vector<16x128xf32> -> vector<16x128xf32>
    %57 = arith.addf %52, %56 : vector<16x128xf32>
    %c1488 = arith.constant 1488 : index
    %c0_35 = arith.constant 0 : index
    %58 = vector.load %arg1[%c1488, %c0_35] : memref<1840x144xf32, #tpu.memory_space<vmem>>, vector<128x128xf32>
    %cst_36 = arith.constant dense<0.000000e+00> : vector<128xf32>
    %59 = vector.multi_reduction <add>, %57, %cst_36 [0] : vector<16x128xf32> to vector<128xf32>
    %60 = vector.shape_cast %59 : vector<128xf32> to vector<1x128xf32>
    %cst_37 = arith.constant 1.600000e+01 : f32
    %61 = vector.broadcast %cst_37 : f32 to vector<1x128xf32>
    %62 = arith.divf %60, %61 : vector<1x128xf32>
    %63 = arith.mulf %57, %57 : vector<16x128xf32>
    %cst_38 = arith.constant dense<0.000000e+00> : vector<128xf32>
    %64 = vector.multi_reduction <add>, %63, %cst_38 [0] : vector<16x128xf32> to vector<128xf32>
    %65 = vector.shape_cast %64 : vector<128xf32> to vector<1x128xf32>
    %cst_39 = arith.constant 1.600000e+01 : f32
    %66 = vector.broadcast %cst_39 : f32 to vector<1x128xf32>
    %67 = arith.divf %65, %66 : vector<1x128xf32>
    %cst_40 = arith.constant dense<0.000000e+00> : vector<1x128xf32>
    %68 = tpu.matmul %62, %58, %cst_40 {dimension_numbers = #tpu.dot_dimension_numbers<[1], [0], [0], [1], [0, 0, 1, 1], [], []>} : vector<1x128xf32>, vector<128x128xf32>, vector<1x128xf32> -> vector<1x128xf32>
    %cst_41 = arith.constant dense<0.000000e+00> : vector<1x128xf32>
    %69 = tpu.matmul %67, %58, %cst_41 {dimension_numbers = #tpu.dot_dimension_numbers<[1], [0], [0], [1], [0, 0, 1, 1], [], []>} : vector<1x128xf32>, vector<128x128xf32>, vector<1x128xf32> -> vector<1x128xf32>
    %70 = arith.mulf %68, %68 : vector<1x128xf32>
    %71 = arith.subf %69, %70 : vector<1x128xf32>
    %c1826 = arith.constant 1826 : index
    %c0_42 = arith.constant 0 : index
    %72 = vector.load %arg1[%c1826, %c0_42] : memref<1840x144xf32, #tpu.memory_space<vmem>>, vector<1x128xf32>
    %cst_43 = arith.constant 9.99999974E-6 : f32
    %73 = vector.broadcast %cst_43 : f32 to vector<1x128xf32>
    %74 = arith.addf %71, %73 : vector<1x128xf32>
    %75 = math.rsqrt %74 : vector<1x128xf32>
    %76 = arith.mulf %72, %75 : vector<1x128xf32>
    %77 = vector.broadcast %76 : vector<1x128xf32> to vector<16x128xf32>
    %78 = arith.mulf %57, %77 : vector<16x128xf32>
    %c1827 = arith.constant 1827 : index
    %c0_44 = arith.constant 0 : index
    %79 = vector.load %arg1[%c1827, %c0_44] : memref<1840x144xf32, #tpu.memory_space<vmem>>, vector<1x128xf32>
    %80 = arith.mulf %68, %76 : vector<1x128xf32>
    %81 = arith.subf %79, %80 : vector<1x128xf32>
    %82 = vector.broadcast %81 : vector<1x128xf32> to vector<16x128xf32>
    %83 = arith.addf %78, %82 : vector<16x128xf32>
    %cst_45 = arith.constant 0.000000e+00 : f32
    %84 = vector.broadcast %cst_45 : f32 to vector<16x128xf32>
    %85 = arith.cmpf ogt, %83, %84 : vector<16x128xf32>
    %cst_46 = arith.constant 1.000000e-01 : f32
    %86 = vector.broadcast %cst_46 : f32 to vector<16x128xf32>
    %87 = arith.mulf %86, %83 : vector<16x128xf32>
    %88 = arith.select %85, %83, %87 : vector<16x128xi1>, vector<16x128xf32>
    %c848 = arith.constant 848 : index
    %c0_47 = arith.constant 0 : index
    %89 = vector.load %arg1[%c848, %c0_47] : memref<1840x144xf32, #tpu.memory_space<vmem>>, vector<128x64xf32>
    %cst_48 = arith.constant dense<0.000000e+00> : vector<16x64xf32>
    %90 = tpu.matmul %88, %89, %cst_48 {dimension_numbers = #tpu.dot_dimension_numbers<[1], [0], [0], [1], [0, 0, 1, 1], [], []>} : vector<16x128xf32>, vector<128x64xf32>, vector<16x64xf32> -> vector<16x64xf32>
    %c1616 = arith.constant 1616 : index
    %c0_49 = arith.constant 0 : index
    %91 = vector.load %arg1[%c1616, %c0_49] : memref<1840x144xf32, #tpu.memory_space<vmem>>, vector<64x64xf32>
    %cst_50 = arith.constant dense<0.000000e+00> : vector<64xf32>
    %92 = vector.multi_reduction <add>, %90, %cst_50 [0] : vector<16x64xf32> to vector<64xf32>
    %93 = vector.shape_cast %92 : vector<64xf32> to vector<1x64xf32>
    %cst_51 = arith.constant 1.600000e+01 : f32
    %94 = vector.broadcast %cst_51 : f32 to vector<1x64xf32>
    %95 = arith.divf %93, %94 : vector<1x64xf32>
    %96 = arith.mulf %90, %90 : vector<16x64xf32>
    %cst_52 = arith.constant dense<0.000000e+00> : vector<64xf32>
    %97 = vector.multi_reduction <add>, %96, %cst_52 [0] : vector<16x64xf32> to vector<64xf32>
    %98 = vector.shape_cast %97 : vector<64xf32> to vector<1x64xf32>
    %cst_53 = arith.constant 1.600000e+01 : f32
    %99 = vector.broadcast %cst_53 : f32 to vector<1x64xf32>
    %100 = arith.divf %98, %99 : vector<1x64xf32>
    %cst_54 = arith.constant dense<0.000000e+00> : vector<1x64xf32>
    %101 = tpu.matmul %95, %91, %cst_54 {dimension_numbers = #tpu.dot_dimension_numbers<[1], [0], [0], [1], [0, 0, 1, 1], [], []>} : vector<1x64xf32>, vector<64x64xf32>, vector<1x64xf32> -> vector<1x64xf32>
    %cst_55 = arith.constant dense<0.000000e+00> : vector<1x64xf32>
    %102 = tpu.matmul %100, %91, %cst_55 {dimension_numbers = #tpu.dot_dimension_numbers<[1], [0], [0], [1], [0, 0, 1, 1], [], []>} : vector<1x64xf32>, vector<64x64xf32>, vector<1x64xf32> -> vector<1x64xf32>
    %103 = arith.mulf %101, %101 : vector<1x64xf32>
    %104 = arith.subf %102, %103 : vector<1x64xf32>
    %c1828 = arith.constant 1828 : index
    %c0_56 = arith.constant 0 : index
    %105 = vector.load %arg1[%c1828, %c0_56] : memref<1840x144xf32, #tpu.memory_space<vmem>>, vector<1x64xf32>
    %cst_57 = arith.constant 9.99999974E-6 : f32
    %106 = vector.broadcast %cst_57 : f32 to vector<1x64xf32>
    %107 = arith.addf %104, %106 : vector<1x64xf32>
    %108 = math.rsqrt %107 : vector<1x64xf32>
    %109 = arith.mulf %105, %108 : vector<1x64xf32>
    %110 = vector.broadcast %109 : vector<1x64xf32> to vector<16x64xf32>
    %111 = arith.mulf %90, %110 : vector<16x64xf32>
    %c1829 = arith.constant 1829 : index
    %c0_58 = arith.constant 0 : index
    %112 = vector.load %arg1[%c1829, %c0_58] : memref<1840x144xf32, #tpu.memory_space<vmem>>, vector<1x64xf32>
    %113 = arith.mulf %101, %109 : vector<1x64xf32>
    %114 = arith.subf %112, %113 : vector<1x64xf32>
    %115 = vector.broadcast %114 : vector<1x64xf32> to vector<16x64xf32>
    %116 = arith.addf %111, %115 : vector<16x64xf32>
    %cst_59 = arith.constant 0.000000e+00 : f32
    %117 = vector.broadcast %cst_59 : f32 to vector<16x64xf32>
    %118 = arith.cmpf ogt, %116, %117 : vector<16x64xf32>
    %cst_60 = arith.constant 1.000000e-01 : f32
    %119 = vector.broadcast %cst_60 : f32 to vector<16x64xf32>
    %120 = arith.mulf %119, %116 : vector<16x64xf32>
    %121 = arith.select %118, %116, %120 : vector<16x64xi1>, vector<16x64xf32>
    %c1792 = arith.constant 1792 : index
    %c0_61 = arith.constant 0 : index
    %122 = vector.load %arg1[%c1792, %c0_61] : memref<1840x144xf32, #tpu.memory_space<vmem>>, vector<16x16xf32>
    %cst_62 = arith.constant dense<0.000000e+00> : vector<16x64xf32>
    %123 = tpu.matmul %122, %121, %cst_62 {dimension_numbers = #tpu.dot_dimension_numbers<[1], [0], [0], [1], [0, 0, 1, 1], [], []>} : vector<16x16xf32>, vector<16x64xf32>, vector<16x64xf32> -> vector<16x64xf32>
    %c528 = arith.constant 528 : index
    %c0_63 = arith.constant 0 : index
    %124 = vector.load %arg1[%c528, %c0_63] : memref<1840x144xf32, #tpu.memory_space<vmem>>, vector<64x128xf32>
    %cst_64 = arith.constant dense<0.000000e+00> : vector<16x128xf32>
    %125 = tpu.matmul %123, %124, %cst_64 {dimension_numbers = #tpu.dot_dimension_numbers<[1], [0], [0], [1], [0, 0, 1, 1], [], []>} : vector<16x64xf32>, vector<64x128xf32>, vector<16x128xf32> -> vector<16x128xf32>
    %c592 = arith.constant 592 : index
    %c0_65 = arith.constant 0 : index
    %126 = vector.load %arg1[%c592, %c0_65] : memref<1840x144xf32, #tpu.memory_space<vmem>>, vector<64x128xf32>
    %cst_66 = arith.constant dense<0.000000e+00> : vector<16x128xf32>
    %127 = tpu.matmul %121, %126, %cst_66 {dimension_numbers = #tpu.dot_dimension_numbers<[1], [0], [0], [1], [0, 0, 1, 1], [], []>} : vector<16x64xf32>, vector<64x128xf32>, vector<16x128xf32> -> vector<16x128xf32>
    %128 = arith.addf %125, %127 : vector<16x128xf32>
    %c1808 = arith.constant 1808 : index
    %c0_67 = arith.constant 0 : index
    %129 = vector.load %arg1[%c1808, %c0_67] : memref<1840x144xf32, #tpu.memory_space<vmem>>, vector<16x16xf32>
    %cst_68 = arith.constant dense<0.000000e+00> : vector<16x64xf32>
    %130 = tpu.matmul %129, %121, %cst_68 {dimension_numbers = #tpu.dot_dimension_numbers<[1], [0], [0], [1], [0, 0, 1, 1], [], []>} : vector<16x16xf32>, vector<16x64xf32>, vector<16x64xf32> -> vector<16x64xf32>
    %c656 = arith.constant 656 : index
    %c0_69 = arith.constant 0 : index
    %131 = vector.load %arg1[%c656, %c0_69] : memref<1840x144xf32, #tpu.memory_space<vmem>>, vector<64x128xf32>
    %cst_70 = arith.constant dense<0.000000e+00> : vector<16x128xf32>
    %132 = tpu.matmul %130, %131, %cst_70 {dimension_numbers = #tpu.dot_dimension_numbers<[1], [0], [0], [1], [0, 0, 1, 1], [], []>} : vector<16x64xf32>, vector<64x128xf32>, vector<16x128xf32> -> vector<16x128xf32>
    %133 = arith.addf %128, %132 : vector<16x128xf32>
    %c1488_71 = arith.constant 1488 : index
    %c0_72 = arith.constant 0 : index
    %134 = vector.load %arg1[%c1488_71, %c0_72] : memref<1840x144xf32, #tpu.memory_space<vmem>>, vector<128x128xf32>
    %cst_73 = arith.constant dense<0.000000e+00> : vector<128xf32>
    %135 = vector.multi_reduction <add>, %133, %cst_73 [0] : vector<16x128xf32> to vector<128xf32>
    %136 = vector.shape_cast %135 : vector<128xf32> to vector<1x128xf32>
    %cst_74 = arith.constant 1.600000e+01 : f32
    %137 = vector.broadcast %cst_74 : f32 to vector<1x128xf32>
    %138 = arith.divf %136, %137 : vector<1x128xf32>
    %139 = arith.mulf %133, %133 : vector<16x128xf32>
    %cst_75 = arith.constant dense<0.000000e+00> : vector<128xf32>
    %140 = vector.multi_reduction <add>, %139, %cst_75 [0] : vector<16x128xf32> to vector<128xf32>
    %141 = vector.shape_cast %140 : vector<128xf32> to vector<1x128xf32>
    %cst_76 = arith.constant 1.600000e+01 : f32
    %142 = vector.broadcast %cst_76 : f32 to vector<1x128xf32>
    %143 = arith.divf %141, %142 : vector<1x128xf32>
    %cst_77 = arith.constant dense<0.000000e+00> : vector<1x128xf32>
    %144 = tpu.matmul %138, %134, %cst_77 {dimension_numbers = #tpu.dot_dimension_numbers<[1], [0], [0], [1], [0, 0, 1, 1], [], []>} : vector<1x128xf32>, vector<128x128xf32>, vector<1x128xf32> -> vector<1x128xf32>
    %cst_78 = arith.constant dense<0.000000e+00> : vector<1x128xf32>
    %145 = tpu.matmul %143, %134, %cst_78 {dimension_numbers = #tpu.dot_dimension_numbers<[1], [0], [0], [1], [0, 0, 1, 1], [], []>} : vector<1x128xf32>, vector<128x128xf32>, vector<1x128xf32> -> vector<1x128xf32>
    %146 = arith.mulf %144, %144 : vector<1x128xf32>
    %147 = arith.subf %145, %146 : vector<1x128xf32>
    %c1830 = arith.constant 1830 : index
    %c0_79 = arith.constant 0 : index
    %148 = vector.load %arg1[%c1830, %c0_79] : memref<1840x144xf32, #tpu.memory_space<vmem>>, vector<1x128xf32>
    %cst_80 = arith.constant 9.99999974E-6 : f32
    %149 = vector.broadcast %cst_80 : f32 to vector<1x128xf32>
    %150 = arith.addf %147, %149 : vector<1x128xf32>
    %151 = math.rsqrt %150 : vector<1x128xf32>
    %152 = arith.mulf %148, %151 : vector<1x128xf32>
    %153 = vector.broadcast %152 : vector<1x128xf32> to vector<16x128xf32>
    %154 = arith.mulf %133, %153 : vector<16x128xf32>
    %c1831 = arith.constant 1831 : index
    %c0_81 = arith.constant 0 : index
    %155 = vector.load %arg1[%c1831, %c0_81] : memref<1840x144xf32, #tpu.memory_space<vmem>>, vector<1x128xf32>
    %156 = arith.mulf %144, %152 : vector<1x128xf32>
    %157 = arith.subf %155, %156 : vector<1x128xf32>
    %158 = vector.broadcast %157 : vector<1x128xf32> to vector<16x128xf32>
    %159 = arith.addf %154, %158 : vector<16x128xf32>
    %cst_82 = arith.constant 0.000000e+00 : f32
    %160 = vector.broadcast %cst_82 : f32 to vector<16x128xf32>
    %161 = arith.cmpf ogt, %159, %160 : vector<16x128xf32>
    %cst_83 = arith.constant 1.000000e-01 : f32
    %162 = vector.broadcast %cst_83 : f32 to vector<16x128xf32>
    %163 = arith.mulf %162, %159 : vector<16x128xf32>
    %164 = arith.select %161, %159, %163 : vector<16x128xi1>, vector<16x128xf32>
    %165 = arith.addf %164, %88 : vector<16x128xf32>
    %c976 = arith.constant 976 : index
    %c0_84 = arith.constant 0 : index
    %166 = vector.load %arg1[%c976, %c0_84] : memref<1840x144xf32, #tpu.memory_space<vmem>>, vector<128x144xf32>
    %cst_85 = arith.constant dense<0.000000e+00> : vector<16x144xf32>
    %167 = tpu.matmul %165, %166, %cst_85 {dimension_numbers = #tpu.dot_dimension_numbers<[1], [0], [0], [1], [0, 0, 1, 1], [], []>} : vector<16x128xf32>, vector<128x144xf32>, vector<16x144xf32> -> vector<16x144xf32>
    %c1832 = arith.constant 1832 : index
    %c0_86 = arith.constant 0 : index
    %168 = vector.load %arg1[%c1832, %c0_86] : memref<1840x144xf32, #tpu.memory_space<vmem>>, vector<1x144xf32>
    %169 = vector.broadcast %168 : vector<1x144xf32> to vector<16x144xf32>
    %170 = arith.addf %167, %169 : vector<16x144xf32>
    %c0_87 = arith.constant 0 : index
    %c0_88 = arith.constant 0 : index
    %171 = vector.load %arg2[%c0_87, %c0_88] : memref<16x144xf32, #tpu.memory_space<vmem>>, vector<16x144xf32>
    tpu.vector_store %arg2[%c0_87, %c0_88], %170 {strides = array<i32>} : memref<16x144xf32, #tpu.memory_space<vmem>>, vector<16x144xf32>,
    %c1104 = arith.constant 1104 : index
    %c0_89 = arith.constant 0 : index
    %172 = vector.load %arg1[%c1104, %c0_89] : memref<1840x144xf32, #tpu.memory_space<vmem>>, vector<128x64xf32>
    %cst_90 = arith.constant dense<0.000000e+00> : vector<16x64xf32>
    %173 = tpu.matmul %165, %172, %cst_90 {dimension_numbers = #tpu.dot_dimension_numbers<[1], [0], [0], [1], [0, 0, 1, 1], [], []>} : vector<16x128xf32>, vector<128x64xf32>, vector<16x64xf32> -> vector<16x64xf32>
    %c1616_91 = arith.constant 1616 : index
    %c0_92 = arith.constant 0 : index
    %174 = vector.load %arg1[%c1616_91, %c0_92] : memref<1840x144xf32, #tpu.memory_space<vmem>>, vector<64x64xf32>
    %cst_93 = arith.constant dense<0.000000e+00> : vector<64xf32>
    %175 = vector.multi_reduction <add>, %173, %cst_93 [0] : vector<16x64xf32> to vector<64xf32>
    %176 = vector.shape_cast %175 : vector<64xf32> to vector<1x64xf32>
    %cst_94 = arith.constant 1.600000e+01 : f32
    %177 = vector.broadcast %cst_94 : f32 to vector<1x64xf32>
    %178 = arith.divf %176, %177 : vector<1x64xf32>
    %179 = arith.mulf %173, %173 : vector<16x64xf32>
    %cst_95 = arith.constant dense<0.000000e+00> : vector<64xf32>
    %180 = vector.multi_reduction <add>, %179, %cst_95 [0] : vector<16x64xf32> to vector<64xf32>
    %181 = vector.shape_cast %180 : vector<64xf32> to vector<1x64xf32>
    %cst_96 = arith.constant 1.600000e+01 : f32
    %182 = vector.broadcast %cst_96 : f32 to vector<1x64xf32>
    %183 = arith.divf %181, %182 : vector<1x64xf32>
    %cst_97 = arith.constant dense<0.000000e+00> : vector<1x64xf32>
    %184 = tpu.matmul %178, %174, %cst_97 {dimension_numbers = #tpu.dot_dimension_numbers<[1], [0], [0], [1], [0, 0, 1, 1], [], []>} : vector<1x64xf32>, vector<64x64xf32>, vector<1x64xf32> -> vector<1x64xf32>
    %cst_98 = arith.constant dense<0.000000e+00> : vector<1x64xf32>
    %185 = tpu.matmul %183, %174, %cst_98 {dimension_numbers = #tpu.dot_dimension_numbers<[1], [0], [0], [1], [0, 0, 1, 1], [], []>} : vector<1x64xf32>, vector<64x64xf32>, vector<1x64xf32> -> vector<1x64xf32>
    %186 = arith.mulf %184, %184 : vector<1x64xf32>
    %187 = arith.subf %185, %186 : vector<1x64xf32>
    %c1833 = arith.constant 1833 : index
    %c0_99 = arith.constant 0 : index
    %188 = vector.load %arg1[%c1833, %c0_99] : memref<1840x144xf32, #tpu.memory_space<vmem>>, vector<1x64xf32>
    %cst_100 = arith.constant 9.99999974E-6 : f32
    %189 = vector.broadcast %cst_100 : f32 to vector<1x64xf32>
    %190 = arith.addf %187, %189 : vector<1x64xf32>
    %191 = math.rsqrt %190 : vector<1x64xf32>
    %192 = arith.mulf %188, %191 : vector<1x64xf32>
    %193 = vector.broadcast %192 : vector<1x64xf32> to vector<16x64xf32>
    %194 = arith.mulf %173, %193 : vector<16x64xf32>
    %c1834 = arith.constant 1834 : index
    %c0_101 = arith.constant 0 : index
    %195 = vector.load %arg1[%c1834, %c0_101] : memref<1840x144xf32, #tpu.memory_space<vmem>>, vector<1x64xf32>
    %196 = arith.mulf %184, %192 : vector<1x64xf32>
    %197 = arith.subf %195, %196 : vector<1x64xf32>
    %198 = vector.broadcast %197 : vector<1x64xf32> to vector<16x64xf32>
    %199 = arith.addf %194, %198 : vector<16x64xf32>
    %cst_102 = arith.constant 0.000000e+00 : f32
    %200 = vector.broadcast %cst_102 : f32 to vector<16x64xf32>
    %201 = arith.cmpf ogt, %199, %200 : vector<16x64xf32>
    %cst_103 = arith.constant 1.000000e-01 : f32
    %202 = vector.broadcast %cst_103 : f32 to vector<16x64xf32>
    %203 = arith.mulf %202, %199 : vector<16x64xf32>
    %204 = arith.select %201, %199, %203 : vector<16x64xi1>, vector<16x64xf32>
    %c1792_104 = arith.constant 1792 : index
    %c0_105 = arith.constant 0 : index
    %205 = vector.load %arg1[%c1792_104, %c0_105] : memref<1840x144xf32, #tpu.memory_space<vmem>>, vector<16x16xf32>
    %cst_106 = arith.constant dense<0.000000e+00> : vector<16x64xf32>
    %206 = tpu.matmul %205, %204, %cst_106 {dimension_numbers = #tpu.dot_dimension_numbers<[1], [0], [0], [1], [0, 0, 1, 1], [], []>} : vector<16x16xf32>, vector<16x64xf32>, vector<16x64xf32> -> vector<16x64xf32>
    %c720 = arith.constant 720 : index
    %c0_107 = arith.constant 0 : index
    %207 = vector.load %arg1[%c720, %c0_107] : memref<1840x144xf32, #tpu.memory_space<vmem>>, vector<64x128xf32>
    %cst_108 = arith.constant dense<0.000000e+00> : vector<16x128xf32>
    %208 = tpu.matmul %206, %207, %cst_108 {dimension_numbers = #tpu.dot_dimension_numbers<[1], [0], [0], [1], [0, 0, 1, 1], [], []>} : vector<16x64xf32>, vector<64x128xf32>, vector<16x128xf32> -> vector<16x128xf32>
    %c784 = arith.constant 784 : index
    %c0_109 = arith.constant 0 : index
    %209 = vector.load %arg1[%c784, %c0_109] : memref<1840x144xf32, #tpu.memory_space<vmem>>, vector<64x128xf32>
    %cst_110 = arith.constant dense<0.000000e+00> : vector<16x128xf32>
    %210 = tpu.matmul %204, %209, %cst_110 {dimension_numbers = #tpu.dot_dimension_numbers<[1], [0], [0], [1], [0, 0, 1, 1], [], []>} : vector<16x64xf32>, vector<64x128xf32>, vector<16x128xf32> -> vector<16x128xf32>
    %211 = arith.addf %208, %210 : vector<16x128xf32>
    %c1488_111 = arith.constant 1488 : index
    %c0_112 = arith.constant 0 : index
    %212 = vector.load %arg1[%c1488_111, %c0_112] : memref<1840x144xf32, #tpu.memory_space<vmem>>, vector<128x128xf32>
    %cst_113 = arith.constant dense<0.000000e+00> : vector<128xf32>
    %213 = vector.multi_reduction <add>, %211, %cst_113 [0] : vector<16x128xf32> to vector<128xf32>
    %214 = vector.shape_cast %213 : vector<128xf32> to vector<1x128xf32>
    %cst_114 = arith.constant 1.600000e+01 : f32
    %215 = vector.broadcast %cst_114 : f32 to vector<1x128xf32>
    %216 = arith.divf %214, %215 : vector<1x128xf32>
    %217 = arith.mulf %211, %211 : vector<16x128xf32>
    %cst_115 = arith.constant dense<0.000000e+00> : vector<128xf32>
    %218 = vector.multi_reduction <add>, %217, %cst_115 [0] : vector<16x128xf32> to vector<128xf32>
    %219 = vector.shape_cast %218 : vector<128xf32> to vector<1x128xf32>
    %cst_116 = arith.constant 1.600000e+01 : f32
    %220 = vector.broadcast %cst_116 : f32 to vector<1x128xf32>
    %221 = arith.divf %219, %220 : vector<1x128xf32>
    %cst_117 = arith.constant dense<0.000000e+00> : vector<1x128xf32>
    %222 = tpu.matmul %216, %212, %cst_117 {dimension_numbers = #tpu.dot_dimension_numbers<[1], [0], [0], [1], [0, 0, 1, 1], [], []>} : vector<1x128xf32>, vector<128x128xf32>, vector<1x128xf32> -> vector<1x128xf32>
    %cst_118 = arith.constant dense<0.000000e+00> : vector<1x128xf32>
    %223 = tpu.matmul %221, %212, %cst_118 {dimension_numbers = #tpu.dot_dimension_numbers<[1], [0], [0], [1], [0, 0, 1, 1], [], []>} : vector<1x128xf32>, vector<128x128xf32>, vector<1x128xf32> -> vector<1x128xf32>
    %224 = arith.mulf %222, %222 : vector<1x128xf32>
    %225 = arith.subf %223, %224 : vector<1x128xf32>
    %c1835 = arith.constant 1835 : index
    %c0_119 = arith.constant 0 : index
    %226 = vector.load %arg1[%c1835, %c0_119] : memref<1840x144xf32, #tpu.memory_space<vmem>>, vector<1x128xf32>
    %cst_120 = arith.constant 9.99999974E-6 : f32
    %227 = vector.broadcast %cst_120 : f32 to vector<1x128xf32>
    %228 = arith.addf %225, %227 : vector<1x128xf32>
    %229 = math.rsqrt %228 : vector<1x128xf32>
    %230 = arith.mulf %226, %229 : vector<1x128xf32>
    %231 = vector.broadcast %230 : vector<1x128xf32> to vector<16x128xf32>
    %232 = arith.mulf %211, %231 : vector<16x128xf32>
    %c1836 = arith.constant 1836 : index
    %c0_121 = arith.constant 0 : index
    %233 = vector.load %arg1[%c1836, %c0_121] : memref<1840x144xf32, #tpu.memory_space<vmem>>, vector<1x128xf32>
    %234 = arith.mulf %222, %230 : vector<1x128xf32>
    %235 = arith.subf %233, %234 : vector<1x128xf32>
    %236 = vector.broadcast %235 : vector<1x128xf32> to vector<16x128xf32>
    %237 = arith.addf %232, %236 : vector<16x128xf32>
    %cst_122 = arith.constant 0.000000e+00 : f32
    %238 = vector.broadcast %cst_122 : f32 to vector<16x128xf32>
    %239 = arith.cmpf ogt, %237, %238 : vector<16x128xf32>
    %cst_123 = arith.constant 1.000000e-01 : f32
    %240 = vector.broadcast %cst_123 : f32 to vector<16x128xf32>
    %241 = arith.mulf %240, %237 : vector<16x128xf32>
    %242 = arith.select %239, %237, %241 : vector<16x128xi1>, vector<16x128xf32>
    %c1232 = arith.constant 1232 : index
    %c0_124 = arith.constant 0 : index
    %243 = vector.load %arg1[%c1232, %c0_124] : memref<1840x144xf32, #tpu.memory_space<vmem>>, vector<128x144xf32>
    %cst_125 = arith.constant dense<0.000000e+00> : vector<16x144xf32>
    %244 = tpu.matmul %242, %243, %cst_125 {dimension_numbers = #tpu.dot_dimension_numbers<[1], [0], [0], [1], [0, 0, 1, 1], [], []>} : vector<16x128xf32>, vector<128x144xf32>, vector<16x144xf32> -> vector<16x144xf32>
    %c1837 = arith.constant 1837 : index
    %c0_126 = arith.constant 0 : index
    %245 = vector.load %arg1[%c1837, %c0_126] : memref<1840x144xf32, #tpu.memory_space<vmem>>, vector<1x144xf32>
    %246 = vector.broadcast %245 : vector<1x144xf32> to vector<16x144xf32>
    %247 = arith.addf %244, %246 : vector<16x144xf32>
    %c0_127 = arith.constant 0 : index
    %c0_128 = arith.constant 0 : index
    %248 = vector.load %arg3[%c0_127, %c0_128] : memref<16x144xf32, #tpu.memory_space<vmem>>, vector<16x144xf32>
    tpu.vector_store %arg3[%c0_127, %c0_128], %247 {strides = array<i32>} : memref<16x144xf32, #tpu.memory_space<vmem>>, vector<16x144xf32>,
    return
  }
}

</mosaic_0001>

<bundles_post_ra>
// kernel: forward.1
= control target key start
LH: loop header
LB: loop body
LE: loop exit
PB: predicated region body
PF: predicated region fallthrough
CT: control target
= control target key end

     0   :  { %vm21_vm0 = vcmask 261120   ;;  %vm131_vm1 = vcmask 392192   ;;  %v5275_v38 = vmov 0.0|0.0   ;;  %vm5276_vm2 = vmmov 0   ;;  %s6533_s0 = inlined_call_operand.vmem [shape: f32[32,48], index: 0, kind: input, shape index: {}]   ;;  %s6534_s1 = inlined_call_operand.vmem [shape: f32[1840,144], index: 1, kind: input, shape index: {}]   ;;  %s6535_s2 = inlined_call_operand.vmem [shape: f32[16,144], index: 2, kind: output, shape index: {0}]   ;;  %s6536_s3 = inlined_call_operand.vmem [shape: f32[16,144], index: 3, kind: output, shape index: {1}]  }
   0x1   :  { %v13_v0 = vld [vmem:[%s6533_s0] sm:$0xff]  ;;  %v14_v1 = vld [vmem:[%s6533_s0 + $0x8] sm:$0xff]  ;;  %v15_v2 = vld [vmem:[%s6533_s0 + $0x10] sm:$0xff]  ;;  %vm1577_vm9 = vcmask 523264   ;;  %vm1775_vm10 = vcmask 130048  }
   0x2   :  { %v4610_v3 = vpack.c.bf16 %v14_v1, %v13_v0  ;;  %v16_v4 = vld [vmem:[%s6533_s0 + $0x18] sm:$0xff]  ;;  %v17_v5 = vld [vmem:[%s6534_s1 + $0xd20] sm:$0xff]  ;;  %3874 = vmatprep.mubr.msk.f32.mxu1 %vm131_vm1, %v13_v0  ;;  %v126_v8 = vld [vmem:[%s6534_s1 + $0x70] sm:$0xff] }
   0x3   :  { %v4614_v6 = vpack.c.bf16 %v16_v4, %v15_v2  ;;  %3856 = vmatprep.mubr.msk.f32.mxu0 %vm21_vm0, %v17_v5  ;;  %v125_v7 = vld [vmem:[%s6534_s1 + $0x60] sm:$0xff]  ;;  %v128_v11 = vld [vmem:[%s6534_s1 + $0x90] sm:$0xff] }
   0x4   :  { %4611 = vmatprep.subr.bf16.mxu0 %v4610_v3  ;;  %v127_v9 = vld [vmem:[%s6534_s1 + $0x80] sm:$0xff]  ;;  %v4618_v10 = vpack.c.bf16 %v126_v8, %v125_v7  ;;  %v130_v14 = vld [vmem:[%s6534_s1 + $0xb0] sm:$0xff] }
   0x5   :  { %4613 = vmatpush3.bf16.msra.mxu0 %v4610_v3  ;;  %v4622_v12 = vpack.c.bf16 %v128_v11, %v127_v9  ;;  %v129_v13 = vld [vmem:[%s6534_s1 + $0xa0] sm:$0xff]  ;;  %v18_v15 = vld [vmem:[%s6534_s1 + $0xd30] sm:$0xff] }
   0x6   :  { %4615 = vmatprep.subr.bf16.mxu0 %v4614_v6  ;;  %4619 = vmatprep.subr.bf16.mxu1 %v4618_v10  ;;  %v19_v16 = vld [vmem:[%s6534_s1 + $0xd40] sm:$0xff]  ;;  %v4626_v17 = vpack.c.bf16 %v130_v14, %v129_v13  ;;  %v120_v19 = vld [vmem:[%s6534_s1 + $0x10] sm:$0xff] }
   0x7   :  { %4621 = vmatpush3.bf16.msra.mxu1 %v4618_v10  ;;  %v119_v18 = vld [vmem:[%s6534_s1] sm:$0xff]  ;;  %v20_v20 = vld [vmem:[%s6534_s1 + $0xd50] sm:$0xff]  ;;  %v5277_v10 = vmov 0.0  }
   0x8   :  { %4623 = vmatprep.subr.bf16.mxu1 %v4622_v12  ;;  %v326_v21 = vld [vmem:[%s6534_s1 + $0xd60] sm:$0xff]  ;;  %v4630_v22 = vpack.c.bf16 %v120_v19, %v119_v18  ;;  %v122_v24 = vld [vmem:[%s6534_s1 + $0x30] sm:$0xff] }
   0x9   :  { %4617 = vmatpush3.bf16.msra.mxu0 %v4614_v6  ;;  %v121_v23 = vld [vmem:[%s6534_s1 + $0x20] sm:$0xff]  ;;  %v327_v25 = vld [vmem:[%s6534_s1 + $0xd70] sm:$0xff] }
   0xa   :  { %4643 = vmatprep.subr.bf16.mxu0 %v4610_v3  ;;  %v328_v26 = vld [vmem:[%s6534_s1 + $0xd80] sm:$0xff]  ;;  %v4634_v27 = vpack.c.bf16 %v122_v24, %v121_v23  ;;  %v124_v29 = vld [vmem:[%s6534_s1 + $0x50] sm:$0xff] }
   0xb   :  { %4625 = vmatpush3.bf16.msra.mxu1 %v4622_v12  ;;  %v123_v28 = vld [vmem:[%s6534_s1 + $0x40] sm:$0xff]  ;;  %v329_v30 = vld [vmem:[%s6534_s1 + $0xd90] sm:$0xff] }
   0xc   :  { %3857 = vmatmul.mubr.msk.f32.vlgmr.msra.gmra.mrb[0].mxu0 %vm21_vm0, %v18_v15  ;;  %4627 = vmatprep.subr.bf16.mxu1 %v4626_v17  ;;  %v4638_v31 = vpack.c.bf16 %v124_v29, %v123_v28  ;;  %v427_v32 = vld [vmem:[%s6534_s1 + $0xc0] sm:$0xff]  ;;  %v428_v33 = vld [vmem:[%s6534_s1 + $0xd0] sm:$0xff] }
   0xd   :  { %4645 = vmatpush3.bf16.msra.mxu0 %v4610_v3  ;;  %3859 = vmatprep.mubr.msk.f32.mxu0 %vm21_vm0, %v19_v16  ;;  %v4650_v34 = vpack.c.bf16 %v428_v33, %v427_v32  ;;  %v534_v35 = vld [vmem:[%s6534_s1 + $0xaa0] sm:$0xff]  ;;  %v535_v36 = vld [vmem:[%s6534_s1 + $0xab0] sm:$0xff] }
   0xe   :  { %4647 = vmatprep.subr.bf16.mxu0 %v4614_v6  ;;  %v536_v37 = vld [vmem:[%s6534_s1 + $0xac0] sm:$0xff]  ;;  %v4663_v39 = vpack.c.bf16 %v535_v36, %v534_v35  ;;  %v537_v40 = vld [vmem:[%s6534_s1 + $0xad0] sm:$0xff] }
   0xf   :  { %4629 = vmatpush3.bf16.msra.mxu1 %v4626_v17  ;;  %v4666_v41 = vpack.c.bf16 %v537_v40, %v536_v37  ;;  %v429_v42 = vld [vmem:[%s6534_s1 + $0xe0] sm:$0xff]  ;;  %v430_v43 = vld [vmem:[%s6534_s1 + $0xf0] sm:$0xff] }
  0x10   :  { %3860 = vmatmul.mubr.msk.f32.gmra.mrb[2].mxu0 %vm21_vm0, %v20_v20  ;;  %4631 = vmatprep.subr.bf16.mxu1 %v4630_v22  ;;  %v4654_v46 = vpack.c.bf16 %v430_v43, %v429_v42  ;;  %v431_v47 = vld [vmem:[%s6534_s1 + $0x100] sm:$0xff]  ;;  %v432_v48 = vld [vmem:[%s6534_s1 + $0x110] sm:$0xff] }
  0x11   :  { %4649 = vmatpush3.bf16.msra.mxu0 %v4614_v6  ;;  %3906 = vmatprep.mubr.msk.f32.mxu0 %vm21_vm0, %v326_v21  ;;  %v4658_v51 = vpack.c.bf16 %v432_v48, %v431_v47  ;;  %v538_v56 = vld [vmem:[%s6534_s1 + $0xae0] sm:$0xff]  ;;  %v539_v57 = vld [vmem:[%s6534_s1 + $0xaf0] sm:$0xff] }
  0x12   :  { %3875 = vmatmul.mubr.msk.f32.vlgmr.msra.gmra.mrb[0].mxu1 %vm131_vm1, %v14_v1  ;;  %4662 = vmatprep.subr.bf16.mxu0 %v5275_v38  ;;  %v4669_v58 = vpack.c.bf16 %v539_v57, %v538_v56  ;;  %v540_v59 = vld [vmem:[%s6534_s1 + $0xb00] sm:$0xff]  ;;  %v541_v60 = vld [vmem:[%s6534_s1 + $0xb10] sm:$0xff] }
  0x13   :  { %4633 = vmatpush3.bf16.msra.mxu1 %v4630_v22  ;;  %3877 = vmatprep.mubr.msk.f32.mxu1 %vm131_vm1, %v15_v2  ;;  %v4672_v61 = vpack.c.bf16 %v541_v60, %v540_v59  ;;  %v542_v62 = vld [vmem:[%s6534_s1 + $0xb20] sm:$0xff]  ;;  %v543_v63 = vld [vmem:[%s6534_s1 + $0xb30] sm:$0xff] }
  0x14   :  { %3907 = vmatmul.mubr.msk.f32.vlgmr.msra.gmra.mrb[4].mxu0 %vm21_vm0, %v327_v25  ;;  %4635 = vmatprep.subr.bf16.mxu1 %v4634_v27  ;;  %v4675_v0 = vpack.c.bf16 %v543_v63, %v542_v62  ;;  %v544_v1 = vld [vmem:[%s6534_s1 + $0xb40] sm:$0xff]  ;;  %v545_v2 = vld [vmem:[%s6534_s1 + $0xb50] sm:$0xff] }
  0x15   :  { %3909 = vmatprep.mubr.msk.f32.mxu0 %vm21_vm0, %v328_v26  ;;  %4664 = vmatpush3.bf16.msra.mxu0 %v4663_v39  ;;  %v4678_v3 = vpack.c.bf16 %v545_v2, %v544_v1  ;;  %v547_v5 = vld [vmem:[%s6534_s1 + $0xb70] sm:$0xff]  ;;  %v548_v7 = vld [vmem:[%s6534_s1 + $0xb80] sm:$0xff] }
  0x16   :  { %3878 = vmatmul.mubr.msk.f32.gmra.mrb[2].mxu1 %vm131_vm1, %v16_v4  ;;  %4665 = vmatprep.subr.bf16.mxu0 %v5275_v38  ;;  %v546_v4 = vld [vmem:[%s6534_s1 + $0xb60] sm:$0xff]  ;;  %v549_v8 = vld [vmem:[%s6534_s1 + $0xb90] sm:$0xff] }
  0x17   :  { %4637 = vmatpush3.bf16.msra.mxu1 %v4634_v27  ;;  %v4681_v6 = vpack.c.bf16 %v547_v5, %v546_v4  ;;  %v4684_v9 = vpack.c.bf16 %v549_v8, %v548_v7  ;;  %v752_v40 = vld [vmem:[%s6534_s1 + $0xda0] sm:$0xff] }
  0x18   :  { %3910 = vmatmul.mubr.msk.f32.gmra.mrb[6].mxu0 %vm21_vm0, %v329_v30  ;;  %4639 = vmatprep.subr.bf16.mxu1 %v4638_v31  ;;  %v729_v56 = vld [vmem:[%s6534_s1 + $0xe41] ss:$0 sm:$0xff] }
  0x19   :  { %4667 = vmatpush3.bf16.msra.mxu0 %v4666_v41  ;;  %3962 = vmatprep.mubr.msk.f32.mxu0 %vm5276_vm2, %v5277_v10 }
  0x1a   :  { %4668 = vmatprep.subr.bf16.mxu0 %v5275_v38 }
  0x1b   :  { %4641 = vmatpush3.bf16.msra.mxu1 %v4638_v31 }
  0x1c   :  { %4651 = vmatprep.subr.bf16.mxu1 %v4650_v34 }
  0x1d   :  { %4670 = vmatpush3.bf16.msra.mxu0 %v4669_v58 }
  0x1e   :  { %4671 = vmatprep.subr.bf16.mxu0 %v5275_v38 }
  0x21   :  { %4673 = vmatpush3.bf16.msra.mxu0 %v4672_v61 }
  0x22   :  { %4674 = vmatprep.subr.bf16.mxu0 %v5275_v38 }
  0x25   :  { %4676 = vmatpush3.bf16.msra.mxu0 %v4675_v0 }
  0x26   :  { %4677 = vmatprep.subr.bf16.mxu0 %v5275_v38 }
  0x29   :  { %4679 = vmatpush3.bf16.msra.mxu0 %v4678_v3 }
  0x2a   :  { %4680 = vmatprep.subr.bf16.mxu0 %v5275_v38 }
  0x2d   :  { %4682 = vmatpush3.bf16.msra.mxu0 %v4681_v6 }
  0x2e   :  { %4683 = vmatprep.subr.bf16.mxu0 %v5275_v38 }
  0x31   :  { %4685 = vmatpush3.bf16.msra.mxu0 %v4684_v9 }
  0xdf   :  { %v3858_v44 = vpop.f32.mrb[0].mxu0 }
  0xe0   :  { %v100_v45 = vpop.f32.mrb[1].mxu0 }
  0xe1   :  { %3892 = vmatprep.mubr.msk.f32.mxu1 %vm131_vm1, %v100_v45 }
  0xe2   :  { %3893 = vmatmul.mubr.msk.f32.vlgmr.msra.gmra.mrb[0].mxu1 %vm131_vm1, %v3858_v44 }
  0xe3   :  { %4653 = vmatpush3.bf16.msra.mxu1 %v4650_v34  ;;  %v3861_v49 = vpop.f32.mrb[2].mxu0 }
  0xe4   :  { %v110_v50 = vpop.f32.mrb[3].mxu0  ;;  %4655 = vmatprep.subr.bf16.mxu1 %v4654_v46 }
  0xe5   :  { %3895 = vmatprep.mubr.msk.f32.mxu1 %vm131_vm1, %v110_v50 }
  0xe6   :  { %3896 = vmatmul.mubr.msk.f32.gmra.mrb[2].mxu1 %vm131_vm1, %v3861_v49  ;;  %v721_v49 = vlaneseq }
  0xe7   :  { %4657 = vmatpush3.bf16.msra.mxu1 %v4654_v46  ;;  %v3908_v52 = vpop.f32.mrb[4].mxu0 }
  0xe8   :  { %4659 = vmatprep.subr.bf16.mxu1 %v4658_v51  ;;  %v408_v53 = vpop.f32.mrb[5].mxu0  ;;  %v5484_v50 = vshrl.u32 %v721_v49, 7  ;;  %v1278_v49 = vld [vmem:[%s6534_s1 + $0xbc0] sm:$0xff] }
  0xe9   :  { %3924 = vmatprep.mubr.msk.f32.mxu1 %vm131_vm1, %v408_v53 }
  0xeb   :  { %4661 = vmatpush3.bf16.msra.mxu1 %v4658_v51  ;;  %v3911_v54 = vpop.f32.mrb[6].mxu0  ;;  %v717_v51 = vld [vmem:[%s6534_s1 + $0xe40] ss:$0 sm:$0xff] }
  0xec   :  { %v418_v55 = vpop.f32.mrb[7].mxu0  ;;  %4686 = vmatprep.subr.bf16.mxu1 %v5275_v38 }
  0xee   :  { %3925 = vmatmul.mubr.msk.f32.vlgmr.msra.gmra.mrb[0].mxu1 %vm131_vm1, %v3908_v52  ;;  %v5490_v52 = vsub.s32 0, %v5484_v50 }
  0xef   :  { %3927 = vmatprep.mubr.msk.f32.mxu1 %vm131_vm1, %v418_v55  ;;  %4688 = vmatpush3.bf16.msra.mxu1 %v4663_v39 }
  0xf0   :  { %4689 = vmatprep.subr.bf16.mxu1 %v5275_v38 }
  0xf2   :  { %3928 = vmatmul.mubr.msk.f32.gmra.mrb[2].mxu1 %vm131_vm1, %v3911_v54 }
  0xf3   :  { %4691 = vmatpush3.bf16.msra.mxu1 %v4666_v41  ;;  %3997 = vmatprep.mubr.msk.f32.mxu1 %vm5276_vm2, %v5277_v10  ;;  %v1100_v41 = vld [vmem:[%s6534_s1 + $0xde0] sm:$0xff] }
  0xf4   :  { %4692 = vmatprep.subr.bf16.mxu1 %v5275_v38 }
  0xf7   :  { %4694 = vmatpush3.bf16.msra.mxu1 %v4669_v58 }
  0xf8   :  { %4695 = vmatprep.subr.bf16.mxu1 %v5275_v38 }
  0xfb   :  { %4697 = vmatpush3.bf16.msra.mxu1 %v4672_v61 }
  0xfc   :  { %4698 = vmatprep.subr.bf16.mxu1 %v5275_v38 }
  0xff   :  { %4700 = vmatpush3.bf16.msra.mxu1 %v4675_v0 }
 0x100   :  { %4701 = vmatprep.subr.bf16.mxu1 %v5275_v38 }
 0x103   :  { %4703 = vmatpush3.bf16.msra.mxu1 %v4678_v3 }
 0x104   :  { %4704 = vmatprep.subr.bf16.mxu1 %v5275_v38 }
 0x107   :  { %4706 = vmatpush3.bf16.msra.mxu1 %v4681_v6 }
 0x108   :  { %4707 = vmatprep.subr.bf16.mxu1 %v5275_v38 }
 0x10b   :  { %4709 = vmatpush3.bf16.msra.mxu1 %v4684_v9 }
 0x1c1   :  { %v3926_v11 = vpop.f32.mrb[0].mxu1 }
 0x1c2   :  { %v562_v12 = vmul.f32 %v3926_v11, %v3926_v11  ;;  %v511_v13 = vpop.f32.mrb[1].mxu1 }
 0x1c3   :  { %v550_v14 = vadd.f32 %v3926_v11, %v511_v13  ;;  %v561_v15 = vmul.f32 %v511_v13, %v511_v13 }
 0x1c5   :  { %v565_v16 = vadd.f32 %v562_v12, %v561_v15  ;;  %v3929_v17 = vpop.f32.mrb[2].mxu1  ;;  %v753_v15 = vld [vmem:[%s6534_s1 + $0xdb0] sm:$0xff] }
 0x1c6   :  { %v521_v18 = vpop.f32.mrb[3].mxu1  ;;  %v564_v21 = vmul.f32 %v3929_v17, %v3929_v17 }
 0x1c7   :  { %v551_v19 = vadd.f32 %v550_v14, %v521_v18  ;;  %v563_v20 = vmul.f32 %v521_v18, %v521_v18 }
 0x1c9   :  { %v552_v22 = vadd.f32 %v3929_v17, %v551_v19  ;;  %v566_v23 = vadd.f32 %v565_v16, %v563_v20  ;;  %v1101_v16 = vld [vmem:[%s6534_s1 + $0xdf0] sm:$0xff] }
 0x1ca   :  { %v935_v19 = vld [vmem:[%s6534_s1 + $0x230] sm:$0xff] }
 0x1cb   :  { %v553_v24 = vrot.slane %v552_v22, 4  ;;  %v567_v25 = vadd.f32 %v566_v23, %v564_v21  ;;  %v936_v21 = vld [vmem:[%s6534_s1 + $0x240] sm:$0xff]  ;;  %v852_v23 = vld [vmem:[%s6534_s1 + $0xdd0] sm:$0xff] }
 0x1cd   :  { %v554_v26 = vadd.f32 %v553_v24, %v552_v22  ;;  %v568_v27 = vrot.slane %v567_v25, 4  ;;  %v937_v22 = vld [vmem:[%s6534_s1 + $0x250] sm:$0xff] }
 0x1ce   :  { %v4730_v24 = vpack.c.bf16 %v937_v22, %v936_v21  ;;  %v849_v22 = vld [vmem:[%s6534_s1 + $0x200] sm:$0xff] }
 0x1cf   :  { %v555_v28 = vrot.slane %v554_v26, 2  ;;  %v569_v29 = vadd.f32 %v568_v27, %v567_v25  ;;  %v938_v25 = vld [vmem:[%s6534_s1 + $0x260] sm:$0xff] }
 0x1d1   :  { %v556_v30 = vadd.f32 %v555_v28, %v554_v26  ;;  %v570_v31 = vrot.slane %v569_v29, 2  ;;  %v939_v26 = vld [vmem:[%s6534_s1 + $0x270] sm:$0xff]  ;;  %v940_v28 = vld [vmem:[%s6534_s1 + $0x280] sm:$0xff] }
 0x1d2   :  { %v4734_v27 = vpack.c.bf16 %v939_v26, %v938_v25  ;;  %v1183_v25 = vld [vmem:[%s6534_s1 + $0x320] sm:$0xff]  ;;  %v1184_v26 = vld [vmem:[%s6534_s1 + $0x330] sm:$0xff] }
 0x1d3   :  { %v557_v32 = vrot.slane %v556_v30, 1  ;;  %v571_v33 = vadd.f32 %v570_v31, %v569_v29  ;;  %v941_v29 = vld [vmem:[%s6534_s1 + $0x290] sm:$0xff]  ;;  %v942_v31 = vld [vmem:[%s6534_s1 + $0x2a0] sm:$0xff] }
 0x1d5   :  { %v558_v34 = vadd.f32 %v557_v32, %v556_v30  ;;  %v572_v35 = vrot.slane %v571_v33, 1  ;;  %v4738_v30 = vpack.c.bf16 %v941_v29, %v940_v28  ;;  %v943_v32 = vld [vmem:[%s6534_s1 + $0x2b0] sm:$0xff]  ;;  %v1185_v28 = vld [vmem:[%s6534_s1 + $0x340] sm:$0xff] }
 0x1d6   :  { %v1186_v29 = vld [vmem:[%s6534_s1 + $0x350] sm:$0xff] }
 0x1d7   :  { %v560_v36 = vmul.f32 0.03125, %v558_v34  ;;  %v573_v37 = vadd.f32 %v572_v35, %v571_v33  ;;  %v4742_v33 = vpack.c.bf16 %v943_v32, %v942_v31  ;;  %v944_v34 = vld [vmem:[%s6534_s1 + $0x2c0] sm:$0xff]  ;;  %v945_v35 = vld [vmem:[%s6534_s1 + $0x2d0] sm:$0xff] }
 0x1d8   :  { %v1187_v31 = vld [vmem:[%s6534_s1 + $0x360] sm:$0xff]  ;;  %v1188_v32 = vld [vmem:[%s6534_s1 + $0x370] sm:$0xff] }
 0x1d9   :  { %3963 = vmatmul.mubr.f32.vlgmr.msra.gmra.mrb[8].mxu0 %v560_v36  ;;  %v574_v39 = vmul.f32 0.03125, %v573_v37  ;;  %v4746_v36 = vpack.c.bf16 %v945_v35, %v944_v34  ;;  %v946_v37 = vld [vmem:[%s6534_s1 + $0x2e0] sm:$0xff]  ;;  %v1190_v35 = vld [vmem:[%s6534_s1 + $0x390] sm:$0xff] }
 0x1da   :  { %4008 = vmatprep.mubr.msk.f32.mxu0 %vm21_vm0, %v752_v40  ;;  %v1189_v34 = vld [vmem:[%s6534_s1 + $0x380] sm:$0xff] }
 0x1db   :  { %3998 = vmatmul.mubr.f32.vlgmr.msra.gmra.mrb[4].mxu1 %v574_v39  ;;  %v947_v39 = vld [vmem:[%s6534_s1 + $0x2f0] sm:$0xff] }
 0x1dc   :  { %4100 = vmatprep.mubr.msk.f32.mxu1 %vm21_vm0, %v1100_v41  ;;  %v4750_v40 = vpack.c.bf16 %v947_v39, %v946_v37  ;;  %v948_v41 = vld [vmem:[%s6534_s1 + $0x300] sm:$0xff]  ;;  %v1192_v39 = vld [vmem:[%s6534_s1 + $0x3b0] sm:$0xff] }
 0x1dd   :  { %v1191_v37 = vld [vmem:[%s6534_s1 + $0x3a0] sm:$0xff] }
 0x2ac   :  { %v641_v42 = vpop.f32.mrb[8].mxu0 }
 0x2ad   :  { %v715_v43 = vmul.f32 %v641_v42, %v641_v42  ;;  %v3964_v44 = vpop.f32.mrb[9].mxu0 }
 0x2ae   :  { %v711_v45 = vpop.f32.mrb[4].mxu1  ;;  %v835_v44 = vld [vmem:[%s6534_s1 + $0x120] sm:$0xff] }
 0x2af   :  { %v716_v46 = vsub.f32 %v711_v45, %v715_v43  ;;  %v3999_v47 = vpop.f32.mrb[5].mxu1  ;;  %v836_v45 = vld [vmem:[%s6534_s1 + $0x130] sm:$0xff] }
 0x2b0   :  { %v1276_v47 = vld [vmem:[%s6534_s1 + $0xba0] sm:$0xff] }
 0x2b1   :  { %v718_v48 = vadd.f32 1e-05, %v716_v46  ;;  %v4758_v46 = vpack.c.bf16 %v836_v45, %v835_v44  ;;  %v1195_v44 = vld [vmem:[%s6534_s1 + $0x3e0] sm:$0xff]  ;;  %v1196_v45 = vld [vmem:[%s6534_s1 + $0x3f0] sm:$0xff] }
 0x2b3   :  { %5263 = vrsqrt.f32 %v718_v48  ;;  %v1277_v48 = vld [vmem:[%s6534_s1 + $0xbb0] sm:$0xff] }
 0x2bd   :  { %v5264_v53 = vpop.eup %5263 }
 0x2be   :  { %v720_v54 = vmul.f32 %v5264_v53, %v717_v51  ;;  %v5579_v51 = vpack.c.bf16 %v1277_v48, %v1276_v47  ;;  %v1279_v53 = vld [vmem:[%s6534_s1 + $0xbd0] sm:$0xff]  ;;  %v1197_v47 = vld [vmem:[%s6534_s1 + $0x400] sm:$0xff] }
 0x2bf   :  { %v1198_v48 = vld [vmem:[%s6534_s1 + $0x410] sm:$0xff] }
 0x2c0   :  { %v724_v55 = vrot.slane %v720_v54, %v5490_v52  ;;  %v730_v57 = vmul.f32 %v720_v54, %v641_v42  ;;  %v949_v42 = vld [vmem:[%s6534_s1 + $0x310] sm:$0xff]  ;;  %v5585_v54 = vpack.c.bf16 %v1279_v53, %v1278_v49  ;;  %v4826_v49 = vpack.c.bf16 %v1198_v48, %v1197_v47  ;;  %v1284_v53 = vld [vmem:[%s6534_s1 + $0xc20] sm:$0xff] }
 0x2c1   :  { %v4754_v43 = vpack.c.bf16 %v949_v42, %v948_v41  ;;  %v1193_v41 = vld [vmem:[%s6534_s1 + $0x3c0] sm:$0xff]  ;;  %v1194_v42 = vld [vmem:[%s6534_s1 + $0x3d0] sm:$0xff] }
 0x2c2   :  { %v725_v58 = vmul.f32 %v724_v55, %v511_v13  ;;  %v726_v59 = vmul.f32 %v3926_v11, %v724_v55  ;;  %v727_v60 = vmul.f32 %v724_v55, %v521_v18  ;;  %v728_v61 = vmul.f32 %v3929_v17, %v724_v55  ;;  %v851_v17 = vld [vmem:[%s6534_s1 + $0xdc0] sm:$0xff]  ;;  %v1493_v48 = vld [vmem:[%s6534_s1 + $0x790] sm:$0xff] }
 0x2c3   :  { %v731_v62 = vsub.f32 %v729_v56, %v730_v57  ;;  %v934_v18 = vld [vmem:[%s6534_s1 + $0x220] sm:$0xff]  ;;  %v1281_v56 = vld [vmem:[%s6534_s1 + $0xbf0] sm:$0xff] }
 0x2c4   :  { %v4726_v20 = vpack.c.bf16 %v935_v19, %v934_v18  ;;  %v1280_v55 = vld [vmem:[%s6534_s1 + $0xbe0] sm:$0xff] }
 0x2c5   :  { %v735_v63 = vrot.slane %v731_v62, %v5490_v52  ;;  %v5595_v57 = vpack.c.bf16 %v1281_v56, %v1280_v55  ;;  %v847_v19 = vld [vmem:[%s6534_s1 + $0x1e0] sm:$0xff]  ;;  %v1285_v55 = vld [vmem:[%s6534_s1 + $0xc30] sm:$0xff] }
 0x2c6   :  { %v5712_v56 = vpack.c.bf16 %v1285_v55, %v1284_v53  ;;  %v1492_v47 = vld [vmem:[%s6534_s1 + $0x780] sm:$0xff] }
 0x2c7   :  { %v736_v0 = vadd.f32 %v735_v63, %v725_v58  ;;  %v737_v1 = vadd.f32 %v735_v63, %v726_v59  ;;  %v738_v2 = vadd.f32 %v735_v63, %v727_v60  ;;  %v739_v3 = vadd.f32 %v735_v63, %v728_v61  ;;  %v1282_v58 = vld [vmem:[%s6534_s1 + $0xc00] sm:$0xff]  ;;  %v1283_v59 = vld [vmem:[%s6534_s1 + $0xc10] sm:$0xff] }
 0x2c8   :  { %v5605_v60 = vpack.c.bf16 %v1283_v59, %v1282_v58  ;;  %v1286_v58 = vld [vmem:[%s6534_s1 + $0xc40] sm:$0xff]  ;;  %v1287_v59 = vld [vmem:[%s6534_s1 + $0xc50] sm:$0xff] }
 0x2c9   :  { %vm740_vm3 = vcmp.gt.f32.partialorder %v736_v0, 0.0  ;;  %vm741_vm4 = vcmp.gt.f32.partialorder %v737_v1, 0.0  ;;  %v744_v4 = vmul.f32 0.1, %v736_v0  ;;  %v745_v5 = vmul.f32 0.1, %v737_v1 }
 0x2ca   :  { %vm742_vm5 = vcmp.gt.f32.partialorder %v738_v2, 0.0  ;;  %vm743_vm6 = vcmp.gt.f32.partialorder %v739_v3, 0.0  ;;  %v746_v6 = vmul.f32 0.1, %v738_v2  ;;  %v747_v7 = vmul.f32 0.1, %v739_v3 }
 0x2cb   :  { %v748_v8 = vsel %vm740_vm3, %v736_v0, %v744_v4  ;;  %v749_v9 = vsel %vm741_vm4, %v737_v1, %v745_v5  ;;  %v837_v1 = vld [vmem:[%s6534_s1 + $0x140] sm:$0xff] }
 0x2cc   :  { %v4710_v11 = vpack.c.bf16 %v749_v9, %v748_v8  ;;  %v750_v12 = vsel %vm742_vm5, %v738_v2, %v746_v6  ;;  %v751_v13 = vsel %vm743_vm6, %v739_v3, %v747_v7  ;;  %v838_v2 = vld [vmem:[%s6534_s1 + $0x150] sm:$0xff]  ;;  %v839_v6 = vld [vmem:[%s6534_s1 + $0x160] sm:$0xff] }
 0x2cd   :  { %v4714_v14 = vpack.c.bf16 %v751_v13, %v750_v12  ;;  %v4762_v5 = vpack.c.bf16 %v838_v2, %v837_v1  ;;  %v840_v7 = vld [vmem:[%s6534_s1 + $0x170] sm:$0xff]  ;;  %v841_v9 = vld [vmem:[%s6534_s1 + $0x180] sm:$0xff] }
 0x2ce   :  { %4711 = vmatprep.subr.bf16.mxu0 %v4710_v11  ;;  %4791 = vmatprep.subr.bf16.mxu1 %v4710_v11  ;;  %v4766_v8 = vpack.c.bf16 %v840_v7, %v839_v6  ;;  %v843_v13 = vld [vmem:[%s6534_s1 + $0x1a0] sm:$0xff]  ;;  %v1291_v2 = vld [vmem:[%s6534_s1 + $0xc90] sm:$0xff] }
 0x2cf   :  { %4713 = vmatpush3.bf16.msra.mxu0 %v4710_v11  ;;  %4793 = vmatpush3.bf16.msra.mxu1 %v4710_v11  ;;  %v1290_v1 = vld [vmem:[%s6534_s1 + $0xc80] sm:$0xff] }
 0x2d0   :  { %4715 = vmatprep.subr.bf16.mxu0 %v4714_v14  ;;  %4795 = vmatprep.subr.bf16.mxu1 %v4714_v14 }
 0x2d3   :  { %4717 = vmatpush3.bf16.msra.mxu0 %v4714_v14  ;;  %4797 = vmatpush3.bf16.msra.mxu1 %v4714_v14 }
 0x2d4   :  { %4719 = vmatprep.subr.bf16.mxu0 %v4710_v11  ;;  %4830 = vmatprep.subr.bf16.mxu1 %v5275_v38 }
 0x2d6   :  { %4009 = vmatmul.mubr.msk.f32.vlgmr.msra.gmra.mrb[10].mxu0 %vm21_vm0, %v753_v15  ;;  %4101 = vmatmul.mubr.msk.f32.vlgmr.msra.gmra.mrb[6].mxu1 %vm21_vm0, %v1101_v16  ;;  %v845_v16 = vld [vmem:[%s6534_s1 + $0x1c0] sm:$0xff] }
 0x2d7   :  { %4721 = vmatpush3.bf16.msra.mxu0 %v4710_v11  ;;  %4019 = vmatprep.mubr.msk.f32.mxu0 %vm21_vm0, %v851_v17  ;;  %v842_v11 = vld [vmem:[%s6534_s1 + $0x190] sm:$0xff] }
 0x2d8   :  { %4723 = vmatprep.subr.bf16.mxu0 %v4714_v14  ;;  %4170 = vmatprep.mubr.msk.f32.mxu1 %vm5276_vm2, %v5277_v10  ;;  %v4770_v12 = vpack.c.bf16 %v842_v11, %v841_v9  ;;  %v846_v17 = vld [vmem:[%s6534_s1 + $0x1d0] sm:$0xff] }
 0x2d9   :  { %4832 = vmatpush3.bf16.msra.mxu1 %v5579_v51  ;;  %v4778_v18 = vpack.c.bf16 %v846_v17, %v845_v16 }
 0x2da   :  { %4833 = vmatprep.subr.bf16.mxu1 %v5275_v38 }
 0x2db   :  { %4725 = vmatpush3.bf16.msra.mxu0 %v4714_v14  ;;  %v844_v14 = vld [vmem:[%s6534_s1 + $0x1b0] sm:$0xff] }
 0x2dc   :  { %4727 = vmatprep.subr.bf16.mxu0 %v4726_v20  ;;  %v4774_v15 = vpack.c.bf16 %v844_v14, %v843_v13 }
 0x2dd   :  { %4835 = vmatpush3.bf16.msra.mxu1 %v5585_v54 }
 0x2de   :  { %4020 = vmatmul.mubr.msk.f32.vlgmr.msra.gmra.mrb[12].mxu0 %vm21_vm0, %v852_v23  ;;  %4836 = vmatprep.subr.bf16.mxu1 %v5275_v38  ;;  %v850_v23 = vld [vmem:[%s6534_s1 + $0x210] sm:$0xff] }
 0x2df   :  { %4729 = vmatpush3.bf16.msra.mxu0 %v4726_v20  ;;  %v848_v20 = vld [vmem:[%s6534_s1 + $0x1f0] sm:$0xff] }
 0x2e0   :  { %4731 = vmatprep.subr.bf16.mxu0 %v4730_v24  ;;  %v4782_v21 = vpack.c.bf16 %v848_v20, %v847_v19 }
 0x2e1   :  { %4838 = vmatpush3.bf16.msra.mxu1 %v5595_v57 }
 0x2e2   :  { %4839 = vmatprep.subr.bf16.mxu1 %v5275_v38 }
 0x2e3   :  { %4733 = vmatpush3.bf16.msra.mxu0 %v4730_v24  ;;  %v4786_v24 = vpack.c.bf16 %v850_v23, %v849_v22 }
 0x2e4   :  { %4735 = vmatprep.subr.bf16.mxu0 %v4734_v27 }
 0x2e5   :  { %4841 = vmatpush3.bf16.msra.mxu1 %v5605_v60 }
 0x2e6   :  { %4842 = vmatprep.subr.bf16.mxu1 %v5275_v38 }
 0x2e7   :  { %4737 = vmatpush3.bf16.msra.mxu0 %v4734_v27  ;;  %v4798_v27 = vpack.c.bf16 %v1184_v26, %v1183_v25  ;;  %v1478_v25 = vld [vmem:[%s6534_s1 + $0x6a0] sm:$0xff]  ;;  %v1479_v26 = vld [vmem:[%s6534_s1 + $0x6b0] sm:$0xff] }
 0x2e8   :  { %4739 = vmatprep.subr.bf16.mxu0 %v4738_v30 }
 0x2e9   :  { %4844 = vmatpush3.bf16.msra.mxu1 %v5712_v56 }
 0x2ea   :  { %4845 = vmatprep.subr.bf16.mxu1 %v5275_v38 }
 0x2eb   :  { %4741 = vmatpush3.bf16.msra.mxu0 %v4738_v30  ;;  %v4802_v30 = vpack.c.bf16 %v1186_v29, %v1185_v28  ;;  %v1480_v28 = vld [vmem:[%s6534_s1 + $0x6c0] sm:$0xff]  ;;  %v1481_v29 = vld [vmem:[%s6534_s1 + $0x6d0] sm:$0xff] }
 0x2ec   :  { %4743 = vmatprep.subr.bf16.mxu0 %v4742_v33 }
 0x2ef   :  { %4745 = vmatpush3.bf16.msra.mxu0 %v4742_v33  ;;  %v4806_v33 = vpack.c.bf16 %v1188_v32, %v1187_v31  ;;  %v1482_v31 = vld [vmem:[%s6534_s1 + $0x6e0] sm:$0xff]  ;;  %v1483_v32 = vld [vmem:[%s6534_s1 + $0x6f0] sm:$0xff] }
 0x2f0   :  { %4747 = vmatprep.subr.bf16.mxu0 %v4746_v36 }
 0x2f3   :  { %4749 = vmatpush3.bf16.msra.mxu0 %v4746_v36  ;;  %v4810_v36 = vpack.c.bf16 %v1190_v35, %v1189_v34  ;;  %v1484_v34 = vld [vmem:[%s6534_s1 + $0x700] sm:$0xff]  ;;  %v1485_v35 = vld [vmem:[%s6534_s1 + $0x710] sm:$0xff] }
 0x2f4   :  { %4751 = vmatprep.subr.bf16.mxu0 %v4750_v40 }
 0x2f7   :  { %4753 = vmatpush3.bf16.msra.mxu0 %v4750_v40  ;;  %v4814_v40 = vpack.c.bf16 %v1192_v39, %v1191_v37  ;;  %v4890_v37 = vpack.c.bf16 %v1485_v35, %v1484_v34  ;;  %v1487_v39 = vld [vmem:[%s6534_s1 + $0x730] sm:$0xff] }
 0x2f8   :  { %4755 = vmatprep.subr.bf16.mxu0 %v4754_v43 }
 0x2fb   :  { %4757 = vmatpush3.bf16.msra.mxu0 %v4754_v43  ;;  %v4818_v43 = vpack.c.bf16 %v1194_v42, %v1193_v41  ;;  %v1488_v41 = vld [vmem:[%s6534_s1 + $0x740] sm:$0xff]  ;;  %v1489_v42 = vld [vmem:[%s6534_s1 + $0x750] sm:$0xff] }
 0x2fc   :  { %4759 = vmatprep.subr.bf16.mxu0 %v4758_v46 }
 0x3a9   :  { %v4010_v61 = vpop.f32.mrb[10].mxu0  ;;  %v5610_v62 = vpop.f32.mrb[6].mxu1 }
 0x3aa   :  { %v826_v63 = vpop.f32.mrb[11].mxu0  ;;  %v1174_v0 = vpop.f32.mrb[7].mxu1 }
 0x3b1   :  { %v4021_v3 = vpop.f32.mrb[12].mxu0 }
 0x3b2   :  { %v925_v4 = vpop.f32.mrb[13].mxu0 }
 0x3b3   :  { %4054 = vmatprep.mubr.f32.mxu0 %v925_v4 }
 0x3b4   :  { %4055 = vmatmul.mubr.f32.vlgmr.msra.gmra.mrb[14].mxu0 %v4021_v3  ;;  %v5742_v3 = vpack.c.bf16 %v1291_v2, %v1290_v1  ;;  %v1453_v2 = vld [vmem:[%s6534_s1 + $0xe42] ss:$0 sm:$0xff] }
 0x3b5   :  { %4761 = vmatpush3.bf16.msra.mxu0 %v4758_v46  ;;  %4089 = vmatprep.mubr.f32.mxu0 %v826_v63  ;;  %v4822_v46 = vpack.c.bf16 %v1196_v45, %v1195_v44  ;;  %v1289_v63 = vld [vmem:[%s6534_s1 + $0xc70] sm:$0xff]  ;;  %v1490_v44 = vld [vmem:[%s6534_s1 + $0x760] sm:$0xff] }
 0x3b6   :  { %4763 = vmatprep.subr.bf16.mxu0 %v4762_v5  ;;  %v1491_v45 = vld [vmem:[%s6534_s1 + $0x770] sm:$0xff] }
 0x3b9   :  { %4765 = vmatpush3.bf16.msra.mxu0 %v4762_v5 }
 0x3ba   :  { %4767 = vmatprep.subr.bf16.mxu0 %v4766_v8 }
 0x3bd   :  { %4769 = vmatpush3.bf16.msra.mxu0 %v4766_v8 }
 0x3be   :  { %4771 = vmatprep.subr.bf16.mxu0 %v4770_v12 }
 0x3c1   :  { %4773 = vmatpush3.bf16.msra.mxu0 %v4770_v12 }
 0x3c2   :  { %4775 = vmatprep.subr.bf16.mxu0 %v4774_v15 }
 0x3c5   :  { %4777 = vmatpush3.bf16.msra.mxu0 %v4774_v15 }
 0x3c6   :  { %4779 = vmatprep.subr.bf16.mxu0 %v4778_v18 }
 0x3c9   :  { %4781 = vmatpush3.bf16.msra.mxu0 %v4778_v18 }
 0x3ca   :  { %4783 = vmatprep.subr.bf16.mxu0 %v4782_v21 }
 0x3cd   :  { %4785 = vmatpush3.bf16.msra.mxu0 %v4782_v21 }
 0x3ce   :  { %4787 = vmatprep.subr.bf16.mxu0 %v4786_v24 }
 0x3d1   :  { %4789 = vmatpush3.bf16.msra.mxu0 %v4786_v24 }
 0x3d2   :  { %4799 = vmatprep.subr.bf16.mxu0 %v4798_v27 }
 0x3d4   :  { %4090 = vmatmul.mubr.f32.vlgmr.msra.gmra.mrb[14].mxu0 %v4010_v61  ;;  %v5722_v61 = vpack.c.bf16 %v1287_v59, %v1286_v58 }
 0x3d5   :  { %4801 = vmatpush3.bf16.msra.mxu0 %v4798_v27  ;;  %4135 = vmatprep.mubr.f32.mxu0 %v1174_v0  ;;  %v4878_v27 = vpack.c.bf16 %v1479_v26, %v1478_v25  ;;  %v1573_v26 = vld [vmem:[%s6534_s1 + $0xce0] sm:$0xff] }
 0x3d6   :  { %4803 = vmatprep.subr.bf16.mxu0 %v4802_v30  ;;  %4847 = vmatpush3.bf16.msra.mxu1 %v5722_v61 }
 0x3d7   :  { %4848 = vmatprep.subr.bf16.mxu1 %v5275_v38 }
 0x3d9   :  { %4805 = vmatpush3.bf16.msra.mxu0 %v4802_v30  ;;  %v4882_v30 = vpack.c.bf16 %v1481_v29, %v1480_v28  ;;  %v1575_v29 = vld [vmem:[%s6534_s1 + $0xd00] sm:$0xff] }
 0x3da   :  { %4807 = vmatprep.subr.bf16.mxu0 %v4806_v33 }
 0x3dd   :  { %4809 = vmatpush3.bf16.msra.mxu0 %v4806_v33  ;;  %v4886_v33 = vpack.c.bf16 %v1483_v32, %v1482_v31 }
 0x3de   :  { %4811 = vmatprep.subr.bf16.mxu0 %v4810_v36 }
 0x3e1   :  { %4813 = vmatpush3.bf16.msra.mxu0 %v4810_v36  ;;  %v1486_v36 = vld [vmem:[%s6534_s1 + $0x720] sm:$0xff] }
 0x3e2   :  { %4815 = vmatprep.subr.bf16.mxu0 %v4814_v40 }
 0x3e5   :  { %4817 = vmatpush3.bf16.msra.mxu0 %v4814_v40  ;;  %v4894_v40 = vpack.c.bf16 %v1487_v39, %v1486_v36 }
 0x3e6   :  { %4819 = vmatprep.subr.bf16.mxu0 %v4818_v43 }
 0x3e9   :  { %4821 = vmatpush3.bf16.msra.mxu0 %v4818_v43  ;;  %v4898_v43 = vpack.c.bf16 %v1489_v42, %v1488_v41 }
 0x3ea   :  { %4823 = vmatprep.subr.bf16.mxu0 %v4822_v46 }
 0x3ed   :  { %4825 = vmatpush3.bf16.msra.mxu0 %v4822_v46  ;;  %v4902_v46 = vpack.c.bf16 %v1491_v45, %v1490_v44 }
 0x3ee   :  { %4827 = vmatprep.subr.bf16.mxu0 %v4826_v49 }
 0x3f1   :  { %4829 = vmatpush3.bf16.msra.mxu0 %v4826_v49  ;;  %v4906_v49 = vpack.c.bf16 %v1493_v48, %v1492_v47 }
 0x3f2   :  { %4910 = vmatprep.subr.bf16.mxu0 %v5275_v38 }
 0x3f4   :  { %4136 = vmatmul.mubr.f32.vlgmr.msra.gmra.mrb[14].mxu0 %v5610_v62  ;;  %v1288_v62 = vld [vmem:[%s6534_s1 + $0xc60] sm:$0xff] }
 0x3f5   :  { %4259 = vmatprep.mubr.msk.f32.mxu0 %vm5276_vm2, %v5277_v10  ;;  %v5732_v0 = vpack.c.bf16 %v1289_v63, %v1288_v62 }
 0x3f7   :  { %4850 = vmatpush3.bf16.msra.mxu1 %v5732_v0 }
 0x3f8   :  { %4851 = vmatprep.subr.bf16.mxu1 %v5275_v38 }
 0x3fb   :  { %4853 = vmatpush3.bf16.msra.mxu1 %v5742_v3 }
 0x3fc   :  { %4854 = vmatprep.subr.bf16.mxu1 %v5275_v38 }
 0x4c7   :  { %v5746_v4 = vpop.f32.mrb[14].mxu0 }
 0x4c8   :  { %v1302_v5 = vmul.f32 %v5746_v4, %v5746_v4  ;;  %v5750_v6 = vpop.f32.mrb[15].mxu0 }
 0x4c9   :  { %v1292_v7 = vadd.f32 %v5746_v4, %v5750_v6  ;;  %v1301_v8 = vmul.f32 %v5750_v6, %v5750_v6 }
 0x4cb   :  { %v1293_v9 = vrot.slane %v1292_v7, 4  ;;  %v1303_v11 = vadd.f32 %v1302_v5, %v1301_v8  ;;  %v1463_v8 = vld [vmem:[%s6534_s1 + $0xe43] ss:$0 sm:$0xff] }
 0x4cd   :  { %v1294_v12 = vadd.f32 %v1293_v9, %v1292_v7  ;;  %v1304_v18 = vrot.slane %v1303_v11, 4 }
 0x4cf   :  { %v1295_v13 = vrot.slane %v1294_v12, 2  ;;  %v1305_v19 = vadd.f32 %v1304_v18, %v1303_v11 }
 0x4d1   :  { %v1296_v14 = vadd.f32 %v1295_v13, %v1294_v12  ;;  %v1306_v20 = vrot.slane %v1305_v19, 2 }
 0x4d3   :  { %v1297_v15 = vrot.slane %v1296_v14, 1  ;;  %v1307_v21 = vadd.f32 %v1306_v20, %v1305_v19 }
 0x4d5   :  { %v1298_v16 = vadd.f32 %v1297_v15, %v1296_v14  ;;  %v1308_v22 = vrot.slane %v1307_v21, 1 }
 0x4d7   :  { %v1300_v17 = vmul.f32 0.0625, %v1298_v16  ;;  %v1309_v23 = vadd.f32 %v1308_v22, %v1307_v21 }
 0x4d9   :  { %4171 = vmatmul.mubr.f32.vlgmr.msra.gmra.mrb[8].mxu1 %v1300_v17  ;;  %v1310_v24 = vmul.f32 0.0625, %v1309_v23  ;;  %v1571_v23 = vld [vmem:[%s6534_s1 + $0xcc0] sm:$0xff] }
 0x4da   :  { %4856 = vmatpush3.bf16.msra.mxu1 %v5579_v51  ;;  %4205 = vmatprep.mubr.msk.f32.mxu1 %vm5276_vm2, %v5277_v10 }
 0x4db   :  { %4857 = vmatprep.subr.bf16.mxu1 %v5275_v38 }
 0x4de   :  { %4859 = vmatpush3.bf16.msra.mxu1 %v5585_v54 }
 0x4df   :  { %4860 = vmatprep.subr.bf16.mxu1 %v5275_v38 }
 0x4e2   :  { %4862 = vmatpush3.bf16.msra.mxu1 %v5595_v57 }
 0x4e3   :  { %4863 = vmatprep.subr.bf16.mxu1 %v5275_v38 }
 0x4e6   :  { %4865 = vmatpush3.bf16.msra.mxu1 %v5605_v60 }
 0x4e7   :  { %4866 = vmatprep.subr.bf16.mxu1 %v5275_v38 }
 0x4ea   :  { %4868 = vmatpush3.bf16.msra.mxu1 %v5712_v56 }
 0x4eb   :  { %4869 = vmatprep.subr.bf16.mxu1 %v5275_v38 }
 0x4ee   :  { %4871 = vmatpush3.bf16.msra.mxu1 %v5722_v61 }
 0x4ef   :  { %4872 = vmatprep.subr.bf16.mxu1 %v5275_v38 }
 0x4f2   :  { %4874 = vmatpush3.bf16.msra.mxu1 %v5732_v0 }
 0x4f3   :  { %4875 = vmatprep.subr.bf16.mxu1 %v5275_v38 }
 0x4f6   :  { %4877 = vmatpush3.bf16.msra.mxu1 %v5742_v3 }
 0x4f7   :  { %4879 = vmatprep.subr.bf16.mxu1 %v4878_v27 }
 0x4f9   :  { %4206 = vmatmul.mubr.f32.vlgmr.msra.gmra.mrb[10].mxu1 %v1310_v24  ;;  %v1572_v24 = vld [vmem:[%s6534_s1 + $0xcd0] sm:$0xff] }
 0x4fa   :  { %4881 = vmatpush3.bf16.msra.mxu1 %v4878_v27  ;;  %v5858_v25 = vpack.c.bf16 %v1572_v24, %v1571_v23  ;;  %v1574_v27 = vld [vmem:[%s6534_s1 + $0xcf0] sm:$0xff] }
 0x4fb   :  { %4883 = vmatprep.subr.bf16.mxu1 %v4882_v30  ;;  %v5870_v28 = vpack.c.bf16 %v1574_v27, %v1573_v26 }
 0x4fe   :  { %4885 = vmatpush3.bf16.msra.mxu1 %v4882_v30  ;;  %v1576_v30 = vld [vmem:[%s6534_s1 + $0xd10] sm:$0xff] }
 0x4ff   :  { %4887 = vmatprep.subr.bf16.mxu1 %v4886_v33  ;;  %v5882_v31 = vpack.c.bf16 %v1576_v30, %v1575_v29  ;;  %v1865_v30 = vld [vmem:[%s6534_s1 + $0x4a0] sm:$0xff] }
 0x502   :  { %4889 = vmatpush3.bf16.msra.mxu1 %v4886_v33 }
 0x503   :  { %4891 = vmatprep.subr.bf16.mxu1 %v4890_v37 }
 0x506   :  { %4893 = vmatpush3.bf16.msra.mxu1 %v4890_v37 }
 0x507   :  { %4895 = vmatprep.subr.bf16.mxu1 %v4894_v40 }
 0x50a   :  { %4897 = vmatpush3.bf16.msra.mxu1 %v4894_v40 }
 0x50b   :  { %4899 = vmatprep.subr.bf16.mxu1 %v4898_v43 }
 0x50e   :  { %4901 = vmatpush3.bf16.msra.mxu1 %v4898_v43 }
 0x50f   :  { %4903 = vmatprep.subr.bf16.mxu1 %v4902_v46 }
 0x512   :  { %4905 = vmatpush3.bf16.msra.mxu1 %v4902_v46 }
 0x513   :  { %4907 = vmatprep.subr.bf16.mxu1 %v4906_v49 }
 0x516   :  { %4909 = vmatpush3.bf16.msra.mxu1 %v4906_v49 }
 0x517   :  { %4922 = vmatprep.subr.bf16.mxu1 %v5275_v38 }
 0x5ac   :  { %v1377_v53 = vpop.f32.mrb[8].mxu1 }
 0x5ad   :  { %v4172_v55 = vpop.f32.mrb[9].mxu1  ;;  %v1451_v58 = vmul.f32 %v1377_v53, %v1377_v53 }
 0x5cc   :  { %v1447_v59 = vpop.f32.mrb[10].mxu1 }
 0x5cd   :  { %v1452_v62 = vsub.f32 %v1447_v59, %v1451_v58  ;;  %v4207_v63 = vpop.f32.mrb[11].mxu1 }
 0x5cf   :  { %v1454_v1 = vadd.f32 1e-05, %v1452_v62 }
 0x5d1   :  { %5265 = vrsqrt.f32 %v1454_v1 }
 0x5db   :  { %v5266_v5 = vpop.eup %5265 }
 0x5dc   :  { %v1456_v7 = vmul.f32 %v5266_v5, %v1453_v2  ;;  %v5895_v2 = vld [vmem:[%s6534_s1 + $0xe00] sm:$0xff] }
 0x5dd   :  { %v2035_v5 = vld [vmem:[%s6534_s1 + $0xe20] sm:$0xff] }
 0x5de   :  { %v1460_v9 = vrot.slane %v1456_v7, %v5490_v52  ;;  %v1464_v11 = vmul.f32 %v1456_v7, %v1377_v53 }
 0x5e0   :  { %v1461_v12 = vmul.f32 %v1460_v9, %v5750_v6  ;;  %v1465_v13 = vsub.f32 %v1463_v8, %v1464_v11  ;;  %v1462_v14 = vmul.f32 %v5746_v4, %v1460_v9  ;;  %v1569_v4 = vld [vmem:[%s6534_s1 + $0xca0] sm:$0xff]  ;;  %v1570_v6 = vld [vmem:[%s6534_s1 + $0xcb0] sm:$0xff] }
 0x5e1   :  { %v5846_v22 = vpack.c.bf16 %v1570_v6, %v1569_v4 }
 0x5e2   :  { %v1469_v15 = vrot.slane %v1465_v13, %v5490_v52 }
 0x5e3   :  { %4912 = vmatpush3.bf16.msra.mxu0 %v5846_v22 }
 0x5e4   :  { %v1470_v16 = vadd.f32 %v1469_v15, %v1461_v12  ;;  %v1471_v17 = vadd.f32 %v1469_v15, %v1462_v14  ;;  %4913 = vmatprep.subr.bf16.mxu0 %v5275_v38  ;;  %v1748_v15 = vld [vmem:[%s6534_s1 + $0xe44] ss:$0 sm:$0xff] }
 0x5e6   :  { %vm1472_vm7 = vcmp.gt.f32.partialorder %v1470_v16, 0.0  ;;  %v1474_v18 = vmul.f32 0.1, %v1470_v16  ;;  %vm1473_vm8 = vcmp.gt.f32.partialorder %v1471_v17, 0.0  ;;  %v1475_v19 = vmul.f32 0.1, %v1471_v17 }
 0x5e7   :  { %4915 = vmatpush3.bf16.msra.mxu0 %v5858_v25 }
 0x5e8   :  { %v5832_v20 = vsel %vm1472_vm7, %v1470_v16, %v1474_v18  ;;  %v5834_v21 = vsel %vm1473_vm8, %v1471_v17, %v1475_v19  ;;  %4916 = vmatprep.subr.bf16.mxu0 %v5275_v38  ;;  %v1758_v18 = vld [vmem:[%s6534_s1 + $0xe45] ss:$0 sm:$0xff] }
 0x5e9   :  { %4240 = vmatprep.mubr.f32.mxu1 %v5832_v20 }
 0x5ea   :  { %4241 = vmatmul.mubr.f32.vlgmr.msra.gmra.mrb[12].mxu1 %v5834_v21 }
 0x5eb   :  { %4278 = vmatprep.mubr.msk.f32.mxu1 %vm5276_vm2, %v5277_v10  ;;  %4924 = vmatpush3.bf16.msra.mxu1 %v5846_v22 }
 0x5ec   :  { %4925 = vmatprep.subr.bf16.mxu1 %v5275_v38  ;;  %4918 = vmatpush3.bf16.msra.mxu0 %v5870_v28 }
 0x5ed   :  { %4919 = vmatprep.subr.bf16.mxu0 %v5275_v38 }
 0x5ef   :  { %4927 = vmatpush3.bf16.msra.mxu1 %v5858_v25 }
 0x5f0   :  { %4928 = vmatprep.subr.bf16.mxu1 %v5275_v38  ;;  %4921 = vmatpush3.bf16.msra.mxu0 %v5882_v31 }
 0x5f3   :  { %4930 = vmatpush3.bf16.msra.mxu1 %v5870_v28 }
 0x5f4   :  { %4931 = vmatprep.subr.bf16.mxu1 %v5275_v38 }
 0x5f7   :  { %4933 = vmatpush3.bf16.msra.mxu1 %v5882_v31 }
 0x6bd   :  { %v4242_v32 = vpop.f32.mrb[12].mxu1 }
 0x6be   :  { %v1579_v33 = vsel %vm1577_vm9, %v4242_v32, 0.0  ;;  %v1589_v34 = vmul.f32 %v4242_v32, %v4242_v32  ;;  %v1560_v35 = vpop.f32.mrb[13].mxu1 }
 0x6bf   :  { %v1578_v36 = vsel %vm1577_vm9, %v1560_v35, 0.0  ;;  %v1588_v37 = vmul.f32 %v1560_v35, %v1560_v35 }
 0x6c0   :  { %v1591_v39 = vsel %vm1577_vm9, %v1589_v34, 0.0  ;;  %v1580_v40 = vadd.f32 %v1579_v33, %v1578_v36  ;;  %v1866_v33 = vld [vmem:[%s6534_s1 + $0x4b0] sm:$0xff] }
 0x6c1   :  { %v1590_v41 = vsel %vm1577_vm9, %v1588_v37, 0.0 }
 0x6c2   :  { %v1581_v42 = vrot.slane %v1580_v40, 4  ;;  %v1592_v43 = vadd.f32 %v1591_v39, %v1590_v41  ;;  %v1868_v41 = vld [vmem:[%s6534_s1 + $0x4d0] sm:$0xff] }
 0x6c4   :  { %v1582_v44 = vadd.f32 %v1581_v42, %v1580_v40  ;;  %v1593_v45 = vrot.slane %v1592_v43, 4  ;;  %v1867_v40 = vld [vmem:[%s6534_s1 + $0x4c0] sm:$0xff]  ;;  %v5926_v42 = vld [vmem:[%s6534_s1 + $0xe10] sm:$0xff] }
 0x6c6   :  { %v1583_v46 = vrot.slane %v1582_v44, 2  ;;  %v1594_v47 = vadd.f32 %v1593_v45, %v1592_v43  ;;  %v2036_v43 = vld [vmem:[%s6534_s1 + $0xe30] sm:$0xff]  ;;  %v1869_v45 = vld [vmem:[%s6534_s1 + $0x4e0] sm:$0xff] }
 0x6c8   :  { %v1584_v48 = vadd.f32 %v1583_v46, %v1582_v44  ;;  %v1595_v49 = vrot.slane %v1594_v47, 2  ;;  %v4942_v44 = vpack.c.bf16 %v1868_v41, %v1867_v40  ;;  %v1870_v46 = vld [vmem:[%s6534_s1 + $0x4f0] sm:$0xff] }
 0x6ca   :  { %v1585_v53 = vrot.slane %v1584_v48, 1  ;;  %v1596_v55 = vadd.f32 %v1595_v49, %v1594_v47  ;;  %v4946_v47 = vpack.c.bf16 %v1870_v46, %v1869_v45  ;;  %v1872_v49 = vld [vmem:[%s6534_s1 + $0x510] sm:$0xff] }
 0x6cc   :  { %v1586_v58 = vadd.f32 %v1585_v53, %v1584_v48  ;;  %v1597_v59 = vrot.slane %v1596_v55, 1  ;;  %v1871_v48 = vld [vmem:[%s6534_s1 + $0x500] sm:$0xff] }
 0x6cd   :  { %v4950_v53 = vpack.c.bf16 %v1872_v49, %v1871_v48 }
 0x6ce   :  { %v1587_v62 = vmul.f32 0.0625, %v1586_v58  ;;  %v1598_v63 = vadd.f32 %v1597_v59, %v1596_v55  ;;  %v1857_v55 = vld [vmem:[%s6534_s1 + $0x420] sm:$0xff]  ;;  %v1858_v58 = vld [vmem:[%s6534_s1 + $0x430] sm:$0xff] }
 0x6cf   :  { %v4954_v59 = vpack.c.bf16 %v1858_v58, %v1857_v55  ;;  %v2522_v58 = vld [vmem:[%s6534_s1 + $0x8a0] sm:$0xff] }
 0x6d0   :  { %4260 = vmatmul.mubr.msk.f32.vlgmr.msra.gmra.mrb[16].mxu0 %vm1577_vm9, %v1587_v62  ;;  %v1599_v1 = vmul.f32 0.0625, %v1598_v63  ;;  %v1859_v62 = vld [vmem:[%s6534_s1 + $0x440] sm:$0xff]  ;;  %v1860_v63 = vld [vmem:[%s6534_s1 + $0x450] sm:$0xff] }
 0x6d1   :  { %4285 = vmatprep.mubr.msk.f32.mxu0 %vm1775_vm10, %v5895_v2 }
 0x6d2   :  { %4279 = vmatmul.mubr.msk.f32.vlgmr.msra.gmra.mrb[14].mxu1 %vm1577_vm9, %v1599_v1  ;;  %v4958_v1 = vpack.c.bf16 %v1860_v63, %v1859_v62  ;;  %v2523_v62 = vld [vmem:[%s6534_s1 + $0x8b0] sm:$0xff] }
 0x6d3   :  { %4330 = vmatprep.mubr.msk.f32.mxu1 %vm1775_vm10, %v2035_v5  ;;  %v1861_v5 = vld [vmem:[%s6534_s1 + $0x460] sm:$0xff]  ;;  %v5070_v63 = vpack.c.bf16 %v2523_v62, %v2522_v58  ;;  %v2423_v58 = vld [vmem:[%s6534_s1 + $0x878] sm:$0xff] }
 0x7a3   :  { %v1669_v7 = vpop.f32.mrb[16].mxu0 }
 0x7a4   :  { %v1746_v8 = vmul.f32 %v1669_v7, %v1669_v7  ;;  %v4261_v9 = vpop.f32.mrb[17].mxu0 }
 0x7a5   :  { %v1742_v11 = vpop.f32.mrb[14].mxu1  ;;  %v1863_v9 = vld [vmem:[%s6534_s1 + $0x480] sm:$0xff] }
 0x7a6   :  { %v1747_v12 = vsub.f32 %v1742_v11, %v1746_v8  ;;  %v4280_v13 = vpop.f32.mrb[15].mxu1  ;;  %v1864_v11 = vld [vmem:[%s6534_s1 + $0x490] sm:$0xff] }
 0x7a7   :  { %v2118_v13 = vld [vmem:[%s6534_s1 + $0x520] sm:$0xff] }
 0x7a8   :  { %v1749_v14 = vadd.f32 1e-05, %v1747_v12  ;;  %v4966_v12 = vpack.c.bf16 %v1864_v11, %v1863_v9  ;;  %v2402_v9 = vld [vmem:[%s6534_s1 + $0x7d0] sm:$0xff] }
 0x7aa   :  { %5267 = vrsqrt.f32 %v1749_v14  ;;  %v2119_v14 = vld [vmem:[%s6534_s1 + $0x530] sm:$0xff] }
 0x7b4   :  { %v5268_v16 = vpop.eup %5267 }
 0x7b5   :  { %v1751_v17 = vmul.f32 %v5268_v16, %v1748_v15  ;;  %v4974_v15 = vpack.c.bf16 %v2119_v14, %v2118_v13  ;;  %v2120_v16 = vld [vmem:[%s6534_s1 + $0x540] sm:$0xff]  ;;  %v2525_v13 = vld [vmem:[%s6534_s1 + $0x8d0] sm:$0xff] }
 0x7b7   :  { %v1755_v19 = vrot.slane %v1751_v17, %v5490_v52  ;;  %v1759_v4 = vmul.f32 %v1751_v17, %v1669_v7  ;;  %v1862_v7 = vld [vmem:[%s6534_s1 + $0x470] sm:$0xff] }
 0x7b8   :  { %v4962_v8 = vpack.c.bf16 %v1862_v7, %v1861_v5  ;;  %v2121_v17 = vld [vmem:[%s6534_s1 + $0x550] sm:$0xff]  ;;  %v2403_v5 = vld [vmem:[%s6534_s1 + $0x7d8] sm:$0xff] }
 0x7b9   :  { %v1760_v6 = vsub.f32 %v1758_v18, %v1759_v4  ;;  %v1756_v23 = vmul.f32 %v1755_v19, %v1560_v35  ;;  %v1757_v24 = vmul.f32 %v4242_v32, %v1755_v19  ;;  %v4938_v32 = vpack.c.bf16 %v1866_v33, %v1865_v30  ;;  %v2125_v30 = vld [vmem:[%s6534_s1 + $0x590] sm:$0xff] }
 0x7bb   :  { %v1764_v26 = vrot.slane %v1760_v6, %v5490_v52  ;;  %v4978_v6 = vpack.c.bf16 %v2121_v17, %v2120_v16  ;;  %v2407_v16 = vld [vmem:[%s6534_s1 + $0x7f8] sm:$0xff] }
 0x7bd   :  { %v1765_v27 = vadd.f32 %v1764_v26, %v1756_v23  ;;  %v1766_v29 = vadd.f32 %v1764_v26, %v1757_v24  ;;  %v2122_v24 = vld [vmem:[%s6534_s1 + $0x560] sm:$0xff]  ;;  %v2123_v26 = vld [vmem:[%s6534_s1 + $0x570] sm:$0xff] }
 0x7bf   :  { %vm1767_vm11 = vcmp.gt.f32.partialorder %v1765_v27, 0.0  ;;  %vm1768_vm12 = vcmp.gt.f32.partialorder %v1766_v29, 0.0  ;;  %v1769_v34 = vmul.f32 0.1, %v1765_v27  ;;  %v1770_v36 = vmul.f32 0.1, %v1766_v29 }
 0x7c1   :  { %v1771_v37 = vsel %vm1767_vm11, %v1765_v27, %v1769_v34  ;;  %v1772_v39 = vsel %vm1768_vm12, %v1766_v29, %v1770_v36  ;;  %v4982_v27 = vpack.c.bf16 %v2123_v26, %v2122_v24  ;;  %v2124_v29 = vld [vmem:[%s6534_s1 + $0x580] sm:$0xff]  ;;  %v2409_v26 = vld [vmem:[%s6534_s1 + $0x808] sm:$0xff] }
 0x7c2   :  { %v4934_v35 = vpack.c.bf16 %v1772_v39, %v1771_v37  ;;  %v4986_v33 = vpack.c.bf16 %v2125_v30, %v2124_v29  ;;  %v2408_v30 = vld [vmem:[%s6534_s1 + $0x800] sm:$0xff] }
 0x7c4   :  { %4935 = vmatprep.subr.bf16.mxu0 %v4934_v35  ;;  %4971 = vmatprep.subr.bf16.mxu1 %v4934_v35 }
 0x7c5   :  { %4937 = vmatpush3.bf16.msra.mxu0 %v4934_v35  ;;  %4973 = vmatpush3.bf16.msra.mxu1 %v4934_v35 }
 0x7c6   :  { %4939 = vmatprep.subr.bf16.mxu0 %v4938_v32  ;;  %4990 = vmatprep.subr.bf16.mxu1 %v5275_v38 }
 0x7c8   :  { %4286 = vmatmul.mubr.msk.f32.vlgmr.msra.gmra.mrb[18].mxu0 %vm1775_vm10, %v5926_v42  ;;  %4331 = vmatmul.mubr.msk.f32.vlgmr.msra.gmra.mrb[16].mxu1 %vm1775_vm10, %v2036_v43 }
 0x7c9   :  { %4941 = vmatpush3.bf16.msra.mxu0 %v4938_v32  ;;  %4304 = vmatprep.mubr.msk.f32.mxu0 %vm1577_vm9, %v1771_v37 }
 0x7ca   :  { %4943 = vmatprep.subr.bf16.mxu0 %v4942_v44  ;;  %4992 = vmatpush3.bf16.msra.mxu1 %v5579_v51 }
 0x7cb   :  { %4993 = vmatprep.subr.bf16.mxu1 %v5275_v38  ;;  %4384 = vmatprep.mubr.msk.f32.mxu1 %vm5276_vm2, %v5277_v10 }
 0x7cd   :  { %4945 = vmatpush3.bf16.msra.mxu0 %v4942_v44 }
 0x7ce   :  { %4947 = vmatprep.subr.bf16.mxu0 %v4946_v47  ;;  %4995 = vmatpush3.bf16.msra.mxu1 %v5585_v54 }
 0x7cf   :  { %4996 = vmatprep.subr.bf16.mxu1 %v5275_v38 }
 0x7d1   :  { %4949 = vmatpush3.bf16.msra.mxu0 %v4946_v47 }
 0x7d2   :  { %4951 = vmatprep.subr.bf16.mxu0 %v4950_v53  ;;  %4998 = vmatpush3.bf16.msra.mxu1 %v5595_v57 }
 0x7d3   :  { %4999 = vmatprep.subr.bf16.mxu1 %v5275_v38 }
 0x7d5   :  { %4953 = vmatpush3.bf16.msra.mxu0 %v4950_v53 }
 0x7d6   :  { %4955 = vmatprep.subr.bf16.mxu0 %v4954_v59  ;;  %5001 = vmatpush3.bf16.msra.mxu1 %v5605_v60 }
 0x7d7   :  { %5002 = vmatprep.subr.bf16.mxu1 %v5275_v38 }
 0x7d8   :  { %4305 = vmatmul.mubr.msk.f32.vlgmr.msra.gmra.mrb[20].mxu0 %vm1577_vm9, %v1772_v39 }
 0x7d9   :  { %4957 = vmatpush3.bf16.msra.mxu0 %v4954_v59 }
 0x7da   :  { %4959 = vmatprep.subr.bf16.mxu0 %v4958_v1  ;;  %5004 = vmatpush3.bf16.msra.mxu1 %v5712_v56 }
 0x7db   :  { %5005 = vmatprep.subr.bf16.mxu1 %v5275_v38 }
 0x7dd   :  { %4961 = vmatpush3.bf16.msra.mxu0 %v4958_v1  ;;  %v2401_v1 = vld [vmem:[%s6534_s1 + $0x7c8] sm:$0xff] }
 0x7de   :  { %4963 = vmatprep.subr.bf16.mxu0 %v4962_v8  ;;  %5007 = vmatpush3.bf16.msra.mxu1 %v5722_v61  ;;  %v5042_v7 = vpack.c.bf16 %v2403_v5, %v2401_v1  ;;  %v2534_v1 = vld [vmem:[%s6534_s1 + $0x960] sm:$0xff]  ;;  %v2535_v5 = vld [vmem:[%s6534_s1 + $0x970] sm:$0xff] }
 0x7df   :  { %5008 = vmatprep.subr.bf16.mxu1 %v5275_v38 }
 0x7e1   :  { %4965 = vmatpush3.bf16.msra.mxu0 %v4962_v8  ;;  %v2400_v8 = vld [vmem:[%s6534_s1 + $0x7c0] sm:$0xff] }
 0x7e2   :  { %4967 = vmatprep.subr.bf16.mxu0 %v4966_v12  ;;  %5010 = vmatpush3.bf16.msra.mxu1 %v5732_v0  ;;  %v5044_v11 = vpack.c.bf16 %v2402_v9, %v2400_v8  ;;  %v5094_v8 = vpack.c.bf16 %v2535_v5, %v2534_v1  ;;  %v2425_v9 = vld [vmem:[%s6534_s1 + $0x888] sm:$0xff] }
 0x7e3   :  { %5011 = vmatprep.subr.bf16.mxu1 %v5275_v38 }
 0x7e5   :  { %4969 = vmatpush3.bf16.msra.mxu0 %v4966_v12  ;;  %v2524_v12 = vld [vmem:[%s6534_s1 + $0x8c0] sm:$0xff] }
 0x7e6   :  { %5013 = vmatpush3.bf16.msra.mxu1 %v5742_v3  ;;  %4975 = vmatprep.subr.bf16.mxu0 %v4974_v15  ;;  %v5074_v14 = vpack.c.bf16 %v2525_v13, %v2524_v12  ;;  %v2424_v12 = vld [vmem:[%s6534_s1 + $0x880] sm:$0xff] }
 0x7e7   :  { %5014 = vmatprep.subr.bf16.mxu1 %v5275_v38 }
 0x89b   :  { %v4287_v18 = vpop.f32.mrb[18].mxu0  ;;  %v4332_v19 = vpop.f32.mrb[16].mxu1 }
 0x89c   :  { %v1848_v4 = vpop.f32.mrb[19].mxu0  ;;  %v2109_v23 = vpop.f32.mrb[17].mxu1 }
 0x89d   :  { %4323 = vmatprep.mubr.msk.f32.mxu0 %vm1577_vm9, %v1848_v4  ;;  %v2526_v4 = vld [vmem:[%s6534_s1 + $0x8e0] sm:$0xff] }
 0x89e   :  { %4324 = vmatmul.mubr.msk.f32.vlgmr.msra.gmra.mrb[20].mxu0 %vm1577_vm9, %v4287_v18  ;;  %v2404_v18 = vld [vmem:[%s6534_s1 + $0x7e0] sm:$0xff] }
 0x89f   :  { %4977 = vmatpush3.bf16.msra.mxu0 %v4974_v15  ;;  %4349 = vmatprep.mubr.msk.f32.mxu0 %vm1577_vm9, %v2109_v23  ;;  %v2405_v15 = vld [vmem:[%s6534_s1 + $0x7e8] sm:$0xff]  ;;  %v2527_v23 = vld [vmem:[%s6534_s1 + $0x8f0] sm:$0xff] }
 0x8a0   :  { %4979 = vmatprep.subr.bf16.mxu0 %v4978_v6  ;;  %v5046_v17 = vpack.c.bf16 %v2407_v16, %v2405_v15  ;;  %v5078_v24 = vpack.c.bf16 %v2527_v23, %v2526_v4  ;;  %v2536_v15 = vld [vmem:[%s6534_s1 + $0x980] sm:$0xff]  ;;  %v2537_v16 = vld [vmem:[%s6534_s1 + $0x990] sm:$0xff] }
 0x8a3   :  { %4981 = vmatpush3.bf16.msra.mxu0 %v4978_v6 }
 0x8a4   :  { %4983 = vmatprep.subr.bf16.mxu0 %v4982_v27 }
 0x8a7   :  { %4985 = vmatpush3.bf16.msra.mxu0 %v4982_v27  ;;  %v2411_v27 = vld [vmem:[%s6534_s1 + $0x818] sm:$0xff] }
 0x8a8   :  { %4987 = vmatprep.subr.bf16.mxu0 %v4986_v33  ;;  %v5050_v29 = vpack.c.bf16 %v2411_v27, %v2409_v26 }
 0x8ab   :  { %4989 = vmatpush3.bf16.msra.mxu0 %v4986_v33  ;;  %v2410_v33 = vld [vmem:[%s6534_s1 + $0x810] sm:$0xff] }
 0x8ae   :  { %4350 = vmatmul.mubr.msk.f32.vlgmr.msra.gmra.mrb[20].mxu0 %vm1577_vm9, %v4332_v19  ;;  %v2406_v19 = vld [vmem:[%s6534_s1 + $0x7f0] sm:$0xff] }
 0x8af   :  { %2505 = vmatprep.mubr.f32.mxu0 %v5277_v10  ;;  %v5048_v6 = vpack.c.bf16 %v2406_v19, %v2404_v18  ;;  %v5098_v18 = vpack.c.bf16 %v2537_v16, %v2536_v15 }
 0x981   :  { %v6020_v34 = vpop.f32.mrb[20].mxu0 }
 0x982   :  { %v2218_v36 = vmul.f32 %v6020_v34, %v6020_v34  ;;  %v6024_v37 = vpop.f32.mrb[21].mxu0 }
 0x983   :  { %v2209_v39 = vadd.f32 %v6020_v34, %v6024_v37  ;;  %v2217_v35 = vmul.f32 %v6024_v37, %v6024_v37 }
 0x985   :  { %v2210_v32 = vrot.slane %v2209_v39, 4  ;;  %v2219_v40 = vadd.f32 %v2218_v36, %v2217_v35  ;;  %v2528_v36 = vld [vmem:[%s6534_s1 + $0x900] sm:$0xff]  ;;  %v2529_v35 = vld [vmem:[%s6534_s1 + $0x910] sm:$0xff] }
 0x987   :  { %v2211_v41 = vadd.f32 %v2210_v32, %v2209_v39  ;;  %v2220_v48 = vrot.slane %v2219_v40, 4  ;;  %v5052_v39 = vpack.c.bf16 %v2410_v33, %v2408_v30  ;;  %v5082_v32 = vpack.c.bf16 %v2529_v35, %v2528_v36  ;;  %v2379_v36 = vld [vmem:[%s6534_s1 + $0xe47] ss:$0 sm:$0xff] }
 0x989   :  { %v2212_v43 = vrot.slane %v2211_v41, 2  ;;  %v2221_v49 = vadd.f32 %v2220_v48, %v2219_v40  ;;  %v2413_v40 = vld [vmem:[%s6534_s1 + $0x828] sm:$0xff]  ;;  %v2531_v48 = vld [vmem:[%s6534_s1 + $0x930] sm:$0xff] }
 0x98b   :  { %v2213_v44 = vadd.f32 %v2212_v43, %v2211_v41  ;;  %v2222_v53 = vrot.slane %v2221_v49, 2  ;;  %v2415_v41 = vld [vmem:[%s6534_s1 + $0x838] sm:$0xff] }
 0x98c   :  { %v5054_v43 = vpack.c.bf16 %v2415_v41, %v2413_v40 }
 0x98d   :  { %v2214_v45 = vrot.slane %v2213_v44, 1 }
 0x98f   :  { %v2215_v46 = vadd.f32 %v2214_v45, %v2213_v44  ;;  %v2412_v44 = vld [vmem:[%s6534_s1 + $0x820] sm:$0xff]  ;;  %v2414_v45 = vld [vmem:[%s6534_s1 + $0x830] sm:$0xff] }
 0x991   :  { %v2216_v47 = vmul.f32 0.0625, %v2215_v46  ;;  %v2530_v46 = vld [vmem:[%s6534_s1 + $0x920] sm:$0xff] }
 0x993   :  { %4385 = vmatmul.mubr.f32.vlgmr.msra.gmra.mrb[18].mxu1 %v2216_v47  ;;  %v5056_v47 = vpack.c.bf16 %v2414_v45, %v2412_v44 }
 0x994   :  { %5016 = vmatpush3.bf16.msra.mxu1 %v5579_v51  ;;  %4419 = vmatprep.mubr.msk.f32.mxu1 %vm5276_vm2, %v5277_v10  ;;  %v2223_v51 = vadd.f32 %v2222_v53, %v2221_v49  ;;  %v5086_v49 = vpack.c.bf16 %v2531_v48, %v2530_v46  ;;  %v2417_v53 = vld [vmem:[%s6534_s1 + $0x848] sm:$0xff] }
 0x995   :  { %5017 = vmatprep.subr.bf16.mxu1 %v5275_v38 }
 0x998   :  { %5019 = vmatpush3.bf16.msra.mxu1 %v5585_v54  ;;  %v2224_v54 = vrot.slane %v2223_v51, 1 }
 0x999   :  { %5020 = vmatprep.subr.bf16.mxu1 %v5275_v38 }
 0x99c   :  { %5022 = vmatpush3.bf16.msra.mxu1 %v5595_v57  ;;  %v2225_v57 = vadd.f32 %v2224_v54, %v2223_v51  ;;  %v2419_v51 = vld [vmem:[%s6534_s1 + $0x858] sm:$0xff] }
 0x99d   :  { %5023 = vmatprep.subr.bf16.mxu1 %v5275_v38  ;;  %v5058_v54 = vpack.c.bf16 %v2419_v51, %v2417_v53 }
 0x9a0   :  { %5025 = vmatpush3.bf16.msra.mxu1 %v5605_v60  ;;  %v2226_v60 = vmul.f32 0.0625, %v2225_v57  ;;  %v2416_v57 = vld [vmem:[%s6534_s1 + $0x840] sm:$0xff] }
 0x9a1   :  { %5026 = vmatprep.subr.bf16.mxu1 %v5275_v38 }
 0x9a4   :  { %5028 = vmatpush3.bf16.msra.mxu1 %v5712_v56  ;;  %v2397_v56 = vld [vmem:[%s6534_s1 + $0x7a8] sm:$0xff] }
 0x9a5   :  { %5029 = vmatprep.subr.bf16.mxu1 %v5275_v38 }
 0x9a8   :  { %5031 = vmatpush3.bf16.msra.mxu1 %v5722_v61  ;;  %v2399_v61 = vld [vmem:[%s6534_s1 + $0x7b8] sm:$0xff] }
 0x9a9   :  { %5032 = vmatprep.subr.bf16.mxu1 %v5275_v38  ;;  %v5038_v55 = vpack.c.bf16 %v2399_v61, %v2397_v56  ;;  %v2532_v56 = vld [vmem:[%s6534_s1 + $0x940] sm:$0xff] }
 0x9ab   :  { %5039 = vmatprep.subr.bf16.mxu0 %v5038_v55  ;;  %v2533_v55 = vld [vmem:[%s6534_s1 + $0x950] sm:$0xff] }
 0x9ac   :  { %5034 = vmatpush3.bf16.msra.mxu1 %v5732_v0  ;;  %v2396_v0 = vld [vmem:[%s6534_s1 + $0x7a0] sm:$0xff] }
 0x9ad   :  { %5035 = vmatprep.subr.bf16.mxu1 %v5275_v38 }
 0x9b0   :  { %5037 = vmatpush3.bf16.msra.mxu1 %v5742_v3  ;;  %v2398_v3 = vld [vmem:[%s6534_s1 + $0x7b0] sm:$0xff] }
 0x9b1   :  { %v5040_v59 = vpack.c.bf16 %v2398_v3, %v2396_v0  ;;  %5071 = vmatprep.subr.bf16.mxu1 %v5070_v63  ;;  %v5090_v0 = vpack.c.bf16 %v2533_v55, %v2532_v56  ;;  %v2421_v3 = vld [vmem:[%s6534_s1 + $0x868] sm:$0xff] }
 0x9b2   :  { %v5062_v62 = vpack.c.bf16 %v2423_v58, %v2421_v3 }
 0x9b3   :  { %4420 = vmatmul.mubr.f32.vlgmr.msra.gmra.mrb[20].mxu1 %v2226_v60  ;;  %5041 = vmatpush1.bf16.msra.mxu0 %v5040_v59  ;;  %v2418_v60 = vld [vmem:[%s6534_s1 + $0x850] sm:$0xff]  ;;  %v2420_v59 = vld [vmem:[%s6534_s1 + $0x860] sm:$0xff] }
 0x9b4   :  { %5073 = vmatpush3.bf16.msra.mxu1 %v5070_v63  ;;  %5043 = vmatprep.subr.bf16.mxu0 %v5042_v7  ;;  %v5060_v61 = vpack.c.bf16 %v2418_v60, %v2416_v57  ;;  %v2422_v63 = vld [vmem:[%s6534_s1 + $0x870] sm:$0xff] }
 0x9b5   :  { %5075 = vmatprep.subr.bf16.mxu1 %v5074_v14  ;;  %v5064_v7 = vpack.c.bf16 %v2422_v63, %v2420_v59 }
 0x9b7   :  { %5045 = vmatpush1.bf16.msra.mxu0 %v5044_v11  ;;  %v2427_v11 = vld [vmem:[%s6534_s1 + $0x898] sm:$0xff] }
 0x9b8   :  { %5077 = vmatpush3.bf16.msra.mxu1 %v5074_v14  ;;  %5047 = vmatprep.subr.bf16.mxu0 %v5046_v17  ;;  %v5066_v13 = vpack.c.bf16 %v2427_v11, %v2425_v9  ;;  %v2426_v14 = vld [vmem:[%s6534_s1 + $0x890] sm:$0xff] }
 0x9b9   :  { %5079 = vmatprep.subr.bf16.mxu1 %v5078_v24  ;;  %v5068_v17 = vpack.c.bf16 %v2426_v14, %v2424_v12 }
 0x9bb   :  { %5049 = vmatpush1.bf16.msra.mxu0 %v5048_v6 }
 0x9bc   :  { %5081 = vmatpush3.bf16.msra.mxu1 %v5078_v24  ;;  %5051 = vmatprep.subr.bf16.mxu0 %v5050_v29  ;;  %v2369_v29 = vld [vmem:[%s6534_s1 + $0xe46] ss:$0 sm:$0xff] }
 0x9bd   :  { %5083 = vmatprep.subr.bf16.mxu1 %v5082_v32 }
 0x9bf   :  { %5053 = vmatpush1.bf16.msra.mxu0 %v5052_v39 }
 0x9c0   :  { %5085 = vmatpush3.bf16.msra.mxu1 %v5082_v32  ;;  %5055 = vmatprep.subr.bf16.mxu0 %v5054_v43 }
 0x9c1   :  { %5087 = vmatprep.subr.bf16.mxu1 %v5086_v49 }
 0x9c3   :  { %5057 = vmatpush1.bf16.msra.mxu0 %v5056_v47 }
 0x9c4   :  { %5089 = vmatpush3.bf16.msra.mxu1 %v5086_v49  ;;  %5059 = vmatprep.subr.bf16.mxu0 %v5058_v54 }
 0x9c5   :  { %5091 = vmatprep.subr.bf16.mxu1 %v5090_v0 }
 0x9c7   :  { %5061 = vmatpush1.bf16.msra.mxu0 %v5060_v61 }
 0x9c8   :  { %5093 = vmatpush3.bf16.msra.mxu1 %v5090_v0  ;;  %5063 = vmatprep.subr.bf16.mxu0 %v5062_v62 }
 0x9c9   :  { %5095 = vmatprep.subr.bf16.mxu1 %v5094_v8 }
 0x9cb   :  { %5065 = vmatpush1.bf16.msra.mxu0 %v5064_v7 }
 0x9cc   :  { %5067 = vmatprep.subr.bf16.mxu0 %v5066_v13  ;;  %5097 = vmatpush3.bf16.msra.mxu1 %v5094_v8 }
 0x9cd   :  { %5099 = vmatprep.subr.bf16.mxu1 %v5098_v18 }
 0x9cf   :  { %5069 = vmatpush1.bf16.msra.mxu0 %v5068_v17 }
 0x9d0   :  { %5102 = vmatprep.subr.bf16.mxu0 %v5275_v38  ;;  %5101 = vmatpush3.bf16.msra.mxu1 %v5098_v18 }
 0xa66   :  { %v2293_v19 = vpop.f32.mrb[18].mxu1 }
 0xa67   :  { %v4386_v4 = vpop.f32.mrb[19].mxu1  ;;  %v2367_v6 = vmul.f32 %v2293_v19, %v2293_v19 }
 0xa86   :  { %v2363_v23 = vpop.f32.mrb[20].mxu1 }
 0xa87   :  { %v2368_v24 = vsub.f32 %v2363_v23, %v2367_v6  ;;  %v4421_v26 = vpop.f32.mrb[21].mxu1 }
 0xa89   :  { %v2370_v27 = vadd.f32 1e-05, %v2368_v24 }
 0xa8b   :  { %5269 = vrsqrt.f32 %v2370_v27 }
 0xa95   :  { %v5270_v30 = vpop.eup %5269 }
 0xa96   :  { %v2372_v33 = vmul.f32 %v5270_v30, %v2369_v29  ;;  %v2911_v30 = vld [vmem:[%s6534_s1 + $0x660] sm:$0xff] }
 0xa98   :  { %v2376_v39 = vrot.slane %v2372_v33, %v5490_v52  ;;  %v2380_v35 = vmul.f32 %v2372_v33, %v2293_v19  ;;  %v2912_v33 = vld [vmem:[%s6534_s1 + $0x670] sm:$0xff] }
 0xa9a   :  { %v2381_v32 = vsub.f32 %v2379_v36, %v2380_v35  ;;  %v2377_v40 = vmul.f32 %v2376_v39, %v6024_v37  ;;  %v2378_v41 = vmul.f32 %v6020_v34, %v2376_v39  ;;  %v5138_v36 = vpack.c.bf16 %v2912_v33, %v2911_v30  ;;  %v2913_v39 = vld [vmem:[%s6534_s1 + $0x680] sm:$0xff]  ;;  %v2914_v35 = vld [vmem:[%s6534_s1 + $0x690] sm:$0xff] }
 0xa9b   :  { %v3087_v30 = vld [vmem:[%s6534_s1 + $0xc40] sm:$0xff]  ;;  %v3088_v33 = vld [vmem:[%s6534_s1 + $0xc50] sm:$0xff] }
 0xa9c   :  { %v2385_v43 = vrot.slane %v2381_v32, %v5490_v52  ;;  %v5142_v32 = vpack.c.bf16 %v2914_v35, %v2913_v39  ;;  %v3089_v39 = vld [vmem:[%s6534_s1 + $0xc60] sm:$0xff]  ;;  %v3090_v35 = vld [vmem:[%s6534_s1 + $0xc70] sm:$0xff] }
 0xa9e   :  { %v2386_v44 = vadd.f32 %v2385_v43, %v2377_v40  ;;  %v2387_v45 = vadd.f32 %v2385_v43, %v2378_v41  ;;  %v2899_v40 = vld [vmem:[%s6534_s1 + $0x5a0] sm:$0xff]  ;;  %v2900_v41 = vld [vmem:[%s6534_s1 + $0x5b0] sm:$0xff] }
 0xa9f   :  { %v5146_v43 = vpack.c.bf16 %v2900_v41, %v2899_v40  ;;  %v3091_v40 = vld [vmem:[%s6534_s1 + $0xc80] sm:$0xff]  ;;  %v3092_v41 = vld [vmem:[%s6534_s1 + $0xc90] sm:$0xff] }
 0xaa0   :  { %vm2388_vm13 = vcmp.gt.f32.partialorder %v2386_v44, 0.0  ;;  %v2390_v46 = vmul.f32 0.1, %v2386_v44  ;;  %vm2389_vm14 = vcmp.gt.f32.partialorder %v2387_v45, 0.0  ;;  %v2391_v47 = vmul.f32 0.1, %v2387_v45 }
 0xaa2   :  { %v2392_v48 = vsel %vm2388_vm13, %v2386_v44, %v2390_v46  ;;  %v2393_v49 = vsel %vm2389_vm14, %v2387_v45, %v2391_v47 }
 0xaa3   :  { %v2394_v53 = vadd.f32 %v2392_v48, %v5832_v20  ;;  %v2395_v51 = vadd.f32 %v2393_v49, %v5834_v21  ;;  %v3450_v20 = vld [vmem:[%s6534_s1 + $0xe50] ss:$8 sm:$0x3]  ;;  %v2437_v21 = vsub.s32 1, %v5484_v50 }
 0xaa5   :  { %2506 = vmatmul.mubr.f32.vlgmr.msra.gmra.mrb[22].mxu0 %v2394_v53  ;;  %4454 = vmatprep.mubr.f32.mxu1 %v2394_v53  ;;  %v2438_v34 = vrot.slane %v3450_v20, %v2437_v21 }
 0xaa6   :  { %4455 = vmatmul.mubr.f32.vlgmr.msra.gmra.mrb[22].mxu1 %v2395_v51  ;;  %2511 = vmatprep.mubr.f32.mxu0 %v5277_v10 }
 0xaa7   :  { %5104 = vmatpush3.bf16.msra.mxu0 %v5846_v22  ;;  %4499 = vmatprep.mubr.msk.f32.mxu1 %vm1775_vm10, %v5895_v2  ;;  %v2434_v2 = vrot.slane %v3450_v20, %v5490_v52 }
 0xaa8   :  { %5105 = vmatprep.subr.bf16.mxu0 %v5275_v38 }
 0xaa9   :  { %2512 = vmatmul.mubr.f32.gmra.mrb[24].mxu0 %v2395_v51  ;;  %v2791_v51 = vld [vmem:[%s6534_s1 + $0xe51] ss:$0 sm:$0xff] }
 0xaaa   :  { %4473 = vmatprep.mubr.msk.f32.mxu0 %vm5276_vm2, %v5277_v10 }
 0xaab   :  { %5107 = vmatpush3.bf16.msra.mxu0 %v5858_v25 }
 0xaac   :  { %5108 = vmatprep.subr.bf16.mxu0 %v5275_v38 }
 0xaaf   :  { %5110 = vmatpush3.bf16.msra.mxu0 %v5870_v28 }
 0xab0   :  { %5111 = vmatprep.subr.bf16.mxu0 %v5275_v38 }
 0xab3   :  { %5113 = vmatpush3.bf16.msra.mxu0 %v5882_v31 }
 0xab4   :  { %5114 = vmatprep.subr.bf16.mxu0 %v5275_v38 }
 0xb78   :  { %v2507_v37 = vpop.f32.mrb[22].mxu0 }
 0xb79   :  { %v2508_v54 = vadd.f32 %v2507_v37, %v2434_v2  ;;  %v2509_v57 = vpop.f32.mrb[23].mxu0  ;;  %v6224_v60 = vpop.f32.mrb[22].mxu1 }
 0xb7a   :  { %v2510_v56 = vadd.f32 %v2509_v57, %v2438_v34  ;;  %v2622_v61 = vsel %vm1577_vm9, %v6224_v60, 0.0  ;;  %v2632_v55 = vmul.f32 %v6224_v60, %v6224_v60  ;;  %v6230_v0 = vpop.f32.mrb[23].mxu1 }
 0xb7b   :  { %2518 = vst [vmem:[%s6535_s2] sm:$0xff] %v2508_v54  ;;  %v2621_v3 = vsel %vm1577_vm9, %v6230_v0, 0.0  ;;  %v2631_v58 = vmul.f32 %v6230_v0, %v6230_v0 }
 0xb7c   :  { %2519 = vst.msk [vmem:[%s6535_s2 + $0x8] sm:$0xff] %vm1775_vm10, %v2510_v56  ;;  %v2634_v59 = vsel %vm1577_vm9, %v2632_v55, 0.0  ;;  %v2623_v62 = vadd.f32 %v2622_v61, %v2621_v3  ;;  %v2513_v63 = vpop.f32.mrb[24].mxu0 }
 0xb7d   :  { %v2633_v1 = vsel %vm1577_vm9, %v2631_v58, 0.0  ;;  %v2514_v5 = vadd.f32 %v2513_v63, %v2434_v2  ;;  %v2515_v7 = vpop.f32.mrb[25].mxu0 }
 0xb7e   :  { %v2624_v8 = vrot.slane %v2623_v62, 4  ;;  %v2635_v9 = vadd.f32 %v2634_v59, %v2633_v1  ;;  %v2516_v11 = vadd.f32 %v2515_v7, %v2438_v34  ;;  %v2801_v34 = vld [vmem:[%s6534_s1 + $0xe52] ss:$0 sm:$0xff]  ;;  %v2901_v59 = vld [vmem:[%s6534_s1 + $0x5c0] sm:$0xff] }
 0xb7f   :  { %2520 = vst [vmem:[%s6535_s2 + $0x10] sm:$0xff] %v2514_v5 }
 0xb80   :  { %v2625_v12 = vadd.f32 %v2624_v8, %v2623_v62  ;;  %2521 = vst.msk [vmem:[%s6535_s2 + $0x18] sm:$0xff] %vm1775_vm10, %v2516_v11  ;;  %v2636_v14 = vrot.slane %v2635_v9, 4  ;;  %v2902_v62 = vld [vmem:[%s6534_s1 + $0x5d0] sm:$0xff]  ;;  %v2903_v8 = vld [vmem:[%s6534_s1 + $0x5e0] sm:$0xff] }
 0xb81   :  { %v5150_v7 = vpack.c.bf16 %v2902_v62, %v2901_v59 }
 0xb82   :  { %v2626_v13 = vrot.slane %v2625_v12, 2  ;;  %v2637_v17 = vadd.f32 %v2636_v14, %v2635_v9  ;;  %v2904_v9 = vld [vmem:[%s6534_s1 + $0x5f0] sm:$0xff] }
 0xb83   :  { %v5154_v11 = vpack.c.bf16 %v2904_v9, %v2903_v8  ;;  %v3282_v9 = vld [vmem:[%s6534_s1 + $0x9c0] sm:$0xff] }
 0xb84   :  { %v2627_v15 = vadd.f32 %v2626_v13, %v2625_v12  ;;  %v2638_v4 = vrot.slane %v2637_v17, 2  ;;  %v2905_v12 = vld [vmem:[%s6534_s1 + $0x600] sm:$0xff]  ;;  %v2906_v13 = vld [vmem:[%s6534_s1 + $0x610] sm:$0xff] }
 0xb85   :  { %v5158_v14 = vpack.c.bf16 %v2906_v13, %v2905_v12  ;;  %v3287_v13 = vld [vmem:[%s6534_s1 + $0x9e8] sm:$0xff] }
 0xb86   :  { %v2628_v16 = vrot.slane %v2627_v15, 1  ;;  %v2639_v6 = vadd.f32 %v2638_v4, %v2637_v17  ;;  %v3079_v17 = vld [vmem:[%s6534_s1 + $0xbc0] sm:$0xff] }
 0xb87   :  { %v3081_v4 = vld [vmem:[%s6534_s1 + $0xbe0] sm:$0xff] }
 0xb88   :  { %v2629_v18 = vadd.f32 %v2628_v16, %v2627_v15  ;;  %v2640_v23 = vrot.slane %v2639_v6, 1  ;;  %v3077_v15 = vld [vmem:[%s6534_s1 + $0xba0] sm:$0xff]  ;;  %v3078_v16 = vld [vmem:[%s6534_s1 + $0xbb0] sm:$0xff] }
 0xb8a   :  { %v2630_v19 = vmul.f32 0.0625, %v2629_v18  ;;  %v2641_v24 = vadd.f32 %v2640_v23, %v2639_v6  ;;  %v3080_v18 = vld [vmem:[%s6534_s1 + $0xbd0] sm:$0xff] }
 0xb8b   :  { %v3082_v6 = vld [vmem:[%s6534_s1 + $0xbf0] sm:$0xff] }
 0xb8c   :  { %4474 = vmatmul.mubr.msk.f32.vlgmr.msra.gmra.mrb[26].mxu0 %vm1577_vm9, %v2630_v19  ;;  %v2642_v26 = vmul.f32 0.0625, %v2641_v24  ;;  %v5166_v19 = vpack.c.bf16 %v3080_v18, %v3079_v17  ;;  %v5169_v23 = vpack.c.bf16 %v3082_v6, %v3081_v4  ;;  %v3083_v24 = vld [vmem:[%s6534_s1 + $0xc00] sm:$0xff]  ;;  %v3291_v18 = vld [vmem:[%s6534_s1 + $0xa08] sm:$0xff] }
 0xb8d   :  { %5116 = vmatpush3.bf16.msra.mxu0 %v5846_v22  ;;  %4492 = vmatprep.mubr.msk.f32.mxu0 %vm5276_vm2, %v5277_v10  ;;  %v2907_v22 = vld [vmem:[%s6534_s1 + $0x620] sm:$0xff] }
 0xb8e   :  { %5117 = vmatprep.subr.bf16.mxu0 %v5275_v38  ;;  %v3290_v6 = vld [vmem:[%s6534_s1 + $0xa00] sm:$0xff] }
 0xb91   :  { %5119 = vmatpush3.bf16.msra.mxu0 %v5858_v25  ;;  %v2908_v25 = vld [vmem:[%s6534_s1 + $0x630] sm:$0xff] }
 0xb92   :  { %5120 = vmatprep.subr.bf16.mxu0 %v5275_v38  ;;  %v5130_v27 = vpack.c.bf16 %v2908_v25, %v2907_v22 }
 0xb95   :  { %5122 = vmatpush3.bf16.msra.mxu0 %v5870_v28  ;;  %v2909_v28 = vld [vmem:[%s6534_s1 + $0x640] sm:$0xff] }
 0xb96   :  { %5123 = vmatprep.subr.bf16.mxu0 %v5275_v38 }
 0xb99   :  { %5125 = vmatpush3.bf16.msra.mxu0 %v5882_v31  ;;  %v2910_v31 = vld [vmem:[%s6534_s1 + $0x650] sm:$0xff] }
 0xb9a   :  { %5131 = vmatprep.subr.bf16.mxu0 %v5130_v27  ;;  %v5134_v29 = vpack.c.bf16 %v2910_v31, %v2909_v28  ;;  %v3085_v28 = vld [vmem:[%s6534_s1 + $0xc20] sm:$0xff]  ;;  %v3086_v31 = vld [vmem:[%s6534_s1 + $0xc30] sm:$0xff] }
 0xb9c   :  { %4493 = vmatmul.mubr.msk.f32.vlgmr.msra.gmra.mrb[28].mxu0 %vm1577_vm9, %v2642_v26  ;;  %v3084_v26 = vld [vmem:[%s6534_s1 + $0xc10] sm:$0xff] }
 0xb9d   :  { %5133 = vmatpush3.bf16.msra.mxu0 %v5130_v27  ;;  %v5172_v22 = vpack.c.bf16 %v3084_v26, %v3083_v24  ;;  %v3295_v26 = vld [vmem:[%s6534_s1 + $0xa28] sm:$0xff] }
 0xb9e   :  { %5135 = vmatprep.subr.bf16.mxu0 %v5134_v29 }
 0xba1   :  { %5137 = vmatpush3.bf16.msra.mxu0 %v5134_v29  ;;  %v5175_v29 = vpack.c.bf16 %v3086_v31, %v3085_v28  ;;  %v3296_v28 = vld [vmem:[%s6534_s1 + $0xa30] sm:$0xff] }
 0xba2   :  { %5139 = vmatprep.subr.bf16.mxu0 %v5138_v36 }
 0xba5   :  { %5141 = vmatpush3.bf16.msra.mxu0 %v5138_v36  ;;  %v5178_v36 = vpack.c.bf16 %v3088_v33, %v3087_v30  ;;  %v3301_v30 = vld [vmem:[%s6534_s1 + $0xa58] sm:$0xff] }
 0xba6   :  { %5143 = vmatprep.subr.bf16.mxu0 %v5142_v32 }
 0xba9   :  { %5145 = vmatpush3.bf16.msra.mxu0 %v5142_v32  ;;  %v5181_v32 = vpack.c.bf16 %v3090_v35, %v3089_v39  ;;  %v3300_v39 = vld [vmem:[%s6534_s1 + $0xa50] sm:$0xff] }
 0xbaa   :  { %5147 = vmatprep.subr.bf16.mxu0 %v5146_v43 }
 0xc5f   :  { %v2712_v44 = vpop.f32.mrb[26].mxu0 }
 0xc60   :  { %v4475_v45 = vpop.f32.mrb[27].mxu0  ;;  %v2789_v46 = vmul.f32 %v2712_v44, %v2712_v44 }
 0xc61   :  { %v3281_v45 = vld [vmem:[%s6534_s1 + $0x9b8] sm:$0xff] }
 0xc6f   :  { %v2785_v47 = vpop.f32.mrb[28].mxu0 }
 0xc70   :  { %v2790_v48 = vsub.f32 %v2785_v47, %v2789_v46  ;;  %v4494_v49 = vpop.f32.mrb[29].mxu0 }
 0xc72   :  { %v2792_v53 = vadd.f32 1e-05, %v2790_v48 }
 0xc74   :  { %5271 = vrsqrt.f32 %v2792_v53 }
 0xc7e   :  { %v5272_v20 = vpop.eup %5271 }
 0xc7f   :  { %v2794_v2 = vmul.f32 %v5272_v20, %v2791_v51 }
 0xc81   :  { %v2798_v37 = vrot.slane %v2794_v2, %v5490_v52  ;;  %v2802_v54 = vmul.f32 %v2794_v2, %v2712_v44  ;;  %v3279_v44 = vld [vmem:[%s6534_s1 + $0x9a8] sm:$0xff] }
 0xc82   :  { %v5210_v46 = vpack.c.bf16 %v3281_v45, %v3279_v44  ;;  %v3304_v44 = vld [vmem:[%s6534_s1 + $0xa70] sm:$0xff]  ;;  %v3307_v45 = vld [vmem:[%s6534_s1 + $0xa88] sm:$0xff] }
 0xc83   :  { %v2799_v57 = vmul.f32 %v2798_v37, %v6230_v0  ;;  %v2803_v56 = vsub.f32 %v2801_v34, %v2802_v54  ;;  %v2800_v61 = vmul.f32 %v6224_v60, %v2798_v37 }
 0xc85   :  { %v2807_v55 = vrot.slane %v2803_v56, %v5490_v52 }
 0xc87   :  { %v2808_v3 = vadd.f32 %v2807_v55, %v2799_v57  ;;  %v2809_v58 = vadd.f32 %v2807_v55, %v2800_v61 }
 0xc89   :  { %vm2810_vm15 = vcmp.gt.f32.partialorder %v2808_v3, 0.0  ;;  %v2812_v63 = vmul.f32 0.1, %v2808_v3  ;;  %vm2811_vm0 = vcmp.gt.f32.partialorder %v2809_v58, 0.0  ;;  %v2813_v1 = vmul.f32 0.1, %v2809_v58 }
 0xc8b   :  { %v2814_v0 = vsel %vm2810_vm15, %v2808_v3, %v2812_v63  ;;  %v2815_v5 = vsel %vm2811_vm0, %v2809_v58, %v2813_v1  ;;  %v3278_v1 = vld [vmem:[%s6534_s1 + $0x9a0] sm:$0xff] }
 0xc8c   :  { %4518 = vmatprep.mubr.msk.f32.mxu0 %vm1577_vm9, %v2814_v0  ;;  %v5126_v60 = vpack.c.bf16 %v2815_v5, %v2814_v0  ;;  %v3280_v0 = vld [vmem:[%s6534_s1 + $0x9b0] sm:$0xff] }
 0xc8d   :  { %4519 = vmatmul.mubr.msk.f32.vlgmr.msra.gmra.mrb[30].mxu0 %vm1577_vm9, %v2815_v5  ;;  %v5212_v5 = vpack.c.bf16 %v3280_v0, %v3278_v1 }
 0xc8e   :  { %5127 = vmatprep.subr.bf16.mxu1 %v5126_v60  ;;  %5149 = vmatpush3.bf16.msra.mxu0 %v5146_v43  ;;  %v5184_v43 = vpack.c.bf16 %v3092_v41, %v3091_v40  ;;  %v3305_v40 = vld [vmem:[%s6534_s1 + $0xa78] sm:$0xff]  ;;  %v3302_v41 = vld [vmem:[%s6534_s1 + $0xa60] sm:$0xff] }
 0xc8f   :  { %5129 = vmatpush3.bf16.msra.mxu1 %v5126_v60  ;;  %5151 = vmatprep.subr.bf16.mxu0 %v5150_v7  ;;  %v3285_v60 = vld [vmem:[%s6534_s1 + $0x9d8] sm:$0xff] }
 0xc90   :  { %5162 = vmatprep.subr.bf16.mxu1 %v5275_v38 }
 0xc92   :  { %4500 = vmatmul.mubr.msk.f32.vlgmr.msra.gmra.mrb[24].mxu1 %vm1775_vm10, %v5926_v42  ;;  %5153 = vmatpush3.bf16.msra.mxu0 %v5150_v7  ;;  %v5163_v42 = vpack.c.bf16 %v3078_v16, %v3077_v15  ;;  %v3283_v7 = vld [vmem:[%s6534_s1 + $0x9c8] sm:$0xff]  ;;  %v3286_v16 = vld [vmem:[%s6534_s1 + $0x9e0] sm:$0xff] }
 0xc93   :  { %5155 = vmatprep.subr.bf16.mxu0 %v5154_v11  ;;  %4572 = vmatprep.mubr.msk.f32.mxu1 %vm5276_vm2, %v5277_v10  ;;  %v5214_v8 = vpack.c.bf16 %v3285_v60, %v3283_v7 }
 0xc94   :  { %5164 = vmatpush3.bf16.msra.mxu1 %v5163_v42 }
 0xc95   :  { %5165 = vmatprep.subr.bf16.mxu1 %v5275_v38 }
 0xc96   :  { %5157 = vmatpush3.bf16.msra.mxu0 %v5154_v11  ;;  %v3284_v11 = vld [vmem:[%s6534_s1 + $0x9d0] sm:$0xff] }
 0xc97   :  { %5159 = vmatprep.subr.bf16.mxu0 %v5158_v14  ;;  %v5216_v12 = vpack.c.bf16 %v3284_v11, %v3282_v9 }
 0xc98   :  { %5167 = vmatpush3.bf16.msra.mxu1 %v5166_v19 }
 0xc99   :  { %5168 = vmatprep.subr.bf16.mxu1 %v5275_v38 }
 0xc9a   :  { %5161 = vmatpush3.bf16.msra.mxu0 %v5158_v14  ;;  %v3289_v14 = vld [vmem:[%s6534_s1 + $0x9f8] sm:$0xff] }
 0xc9b   :  { %5186 = vmatprep.subr.bf16.mxu0 %v5275_v38  ;;  %v5218_v15 = vpack.c.bf16 %v3289_v14, %v3287_v13 }
 0xc9c   :  { %5170 = vmatpush3.bf16.msra.mxu1 %v5169_v23 }
 0xc9d   :  { %5171 = vmatprep.subr.bf16.mxu1 %v5275_v38 }
 0xca0   :  { %5173 = vmatpush3.bf16.msra.mxu1 %v5172_v22 }
 0xca1   :  { %5174 = vmatprep.subr.bf16.mxu1 %v5275_v38 }
 0xca4   :  { %5176 = vmatpush3.bf16.msra.mxu1 %v5175_v29 }
 0xca5   :  { %5177 = vmatprep.subr.bf16.mxu1 %v5275_v38 }
 0xca8   :  { %5179 = vmatpush3.bf16.msra.mxu1 %v5178_v36 }
 0xca9   :  { %5180 = vmatprep.subr.bf16.mxu1 %v5275_v38 }
 0xcac   :  { %5182 = vmatpush3.bf16.msra.mxu1 %v5181_v32 }
 0xcad   :  { %5183 = vmatprep.subr.bf16.mxu1 %v5275_v38 }
 0xcb0   :  { %5185 = vmatpush3.bf16.msra.mxu1 %v5184_v43 }
 0xcb1   :  { %5211 = vmatprep.subr.bf16.mxu1 %v5210_v46  ;;  %v3309_v46 = vld [vmem:[%s6534_s1 + $0xa98] sm:$0xff] }
 0xd65   :  { %v4501_v25 = vpop.f32.mrb[24].mxu1 }
 0xd66   :  { %v2890_v27 = vpop.f32.mrb[25].mxu1 }
 0xd67   :  { %4537 = vmatprep.mubr.msk.f32.mxu0 %vm1577_vm9, %v2890_v27  ;;  %v3294_v27 = vld [vmem:[%s6534_s1 + $0xa20] sm:$0xff] }
 0xd68   :  { %4538 = vmatmul.mubr.msk.f32.vlgmr.msra.gmra.mrb[30].mxu0 %vm1577_vm9, %v4501_v25  ;;  %v5228_v31 = vpack.c.bf16 %v3296_v28, %v3294_v27 }
 0xd69   :  { %5188 = vmatpush3.bf16.msra.mxu0 %v5163_v42  ;;  %4607 = vmatprep.mubr.msk.f32.mxu0 %vm5276_vm2, %v5277_v10  ;;  %v3288_v42 = vld [vmem:[%s6534_s1 + $0x9f0] sm:$0xff] }
 0xd6a   :  { %5189 = vmatprep.subr.bf16.mxu0 %v5275_v38  ;;  %v5220_v17 = vpack.c.bf16 %v3288_v42, %v3286_v16 }
 0xd6d   :  { %5191 = vmatpush3.bf16.msra.mxu0 %v5166_v19  ;;  %v3293_v19 = vld [vmem:[%s6534_s1 + $0xa18] sm:$0xff] }
 0xd6e   :  { %5192 = vmatprep.subr.bf16.mxu0 %v5275_v38  ;;  %v5222_v4 = vpack.c.bf16 %v3293_v19, %v3291_v18 }
 0xd71   :  { %5194 = vmatpush3.bf16.msra.mxu0 %v5169_v23  ;;  %v3292_v23 = vld [vmem:[%s6534_s1 + $0xa10] sm:$0xff] }
 0xd72   :  { %5195 = vmatprep.subr.bf16.mxu0 %v5275_v38  ;;  %v5224_v24 = vpack.c.bf16 %v3292_v23, %v3290_v6 }
 0xd75   :  { %5197 = vmatpush3.bf16.msra.mxu0 %v5172_v22  ;;  %v3297_v22 = vld [vmem:[%s6534_s1 + $0xa38] sm:$0xff] }
 0xd76   :  { %5198 = vmatprep.subr.bf16.mxu0 %v5275_v38  ;;  %v5226_v25 = vpack.c.bf16 %v3297_v22, %v3295_v26 }
 0xd79   :  { %5200 = vmatpush3.bf16.msra.mxu0 %v5175_v29  ;;  %v3299_v29 = vld [vmem:[%s6534_s1 + $0xa48] sm:$0xff] }
 0xd7a   :  { %5201 = vmatprep.subr.bf16.mxu0 %v5275_v38  ;;  %v5230_v33 = vpack.c.bf16 %v3301_v30, %v3299_v29 }
 0xd7d   :  { %5203 = vmatpush3.bf16.msra.mxu0 %v5178_v36  ;;  %v3298_v36 = vld [vmem:[%s6534_s1 + $0xa40] sm:$0xff] }
 0xd7e   :  { %5204 = vmatprep.subr.bf16.mxu0 %v5275_v38  ;;  %v5232_v35 = vpack.c.bf16 %v3300_v39, %v3298_v36 }
 0xd81   :  { %5206 = vmatpush3.bf16.msra.mxu0 %v5181_v32  ;;  %v3303_v32 = vld [vmem:[%s6534_s1 + $0xa68] sm:$0xff] }
 0xd82   :  { %5207 = vmatprep.subr.bf16.mxu0 %v5275_v38 }
 0xd85   :  { %5209 = vmatpush3.bf16.msra.mxu0 %v5184_v43  ;;  %v5234_v43 = vpack.c.bf16 %v3305_v40, %v3303_v32 }
 0xe3b   :  { %v6401_v47 = vpop.f32.mrb[30].mxu0 }
 0xe3c   :  { %v3102_v48 = vmul.f32 %v6401_v47, %v6401_v47  ;;  %v6405_v49 = vpop.f32.mrb[31].mxu0 }
 0xe3d   :  { %v3093_v38 = vadd.f32 %v6401_v47, %v6405_v49  ;;  %v3101_v53 = vmul.f32 %v6405_v49, %v6405_v49 }
 0xe3f   :  { %v3094_v51 = vrot.slane %v3093_v38, 4  ;;  %v3103_v20 = vadd.f32 %v3102_v48, %v3101_v53  ;;  %v5236_v48 = vpack.c.bf16 %v3304_v44, %v3302_v41  ;;  %v3306_v53 = vld [vmem:[%s6534_s1 + $0xa80] sm:$0xff] }
 0xe41   :  { %v3095_v2 = vadd.f32 %v3094_v51, %v3093_v38  ;;  %v3104_v34 = vrot.slane %v3103_v20, 4  ;;  %v5238_v38 = vpack.c.bf16 %v3309_v46, %v3307_v45  ;;  %v3308_v51 = vld [vmem:[%s6534_s1 + $0xa90] sm:$0xff] }
 0xe43   :  { %v3096_v37 = vrot.slane %v3095_v2, 2  ;;  %v3105_v54 = vadd.f32 %v3104_v34, %v3103_v20  ;;  %v5240_v20 = vpack.c.bf16 %v3308_v51, %v3306_v53 }
 0xe45   :  { %v3097_v57 = vadd.f32 %v3096_v37, %v3095_v2  ;;  %v3106_v56 = vrot.slane %v3105_v54, 2 }
 0xe47   :  { %v3098_v61 = vrot.slane %v3097_v57, 1  ;;  %v3107_v55 = vadd.f32 %v3106_v56, %v3105_v54 }
 0xe49   :  { %v3099_v3 = vadd.f32 %v3098_v61, %v3097_v57  ;;  %v3108_v58 = vrot.slane %v3107_v55, 1 }
 0xe4b   :  { %v3100_v59 = vmul.f32 0.0625, %v3099_v3  ;;  %v3109_v62 = vadd.f32 %v3108_v58, %v3107_v55  ;;  %v3253_v55 = vld [vmem:[%s6534_s1 + $0xe53] ss:$0 sm:$0xff] }
 0xe4d   :  { %4573 = vmatmul.mubr.f32.vlgmr.msra.gmra.mrb[26].mxu1 %v3100_v59  ;;  %v3110_v63 = vmul.f32 0.0625, %v3109_v62  ;;  %v3263_v59 = vld [vmem:[%s6534_s1 + $0xe54] ss:$0 sm:$0xff] }
 0xe4e   :  { %3387 = vmatprep.mubr.f32.mxu1 %v5277_v10  ;;  %5213 = vmatpush1.bf16.msra.mxu1 %v5212_v5 }
 0xe4f   :  { %4608 = vmatmul.mubr.f32.vlgmr.msra.gmra.mrb[32].mxu0 %v3110_v63  ;;  %5215 = vmatprep.subr.bf16.mxu1 %v5214_v8 }
 0xe52   :  { %5217 = vmatpush1.bf16.msra.mxu1 %v5216_v12 }
 0xe53   :  { %5219 = vmatprep.subr.bf16.mxu1 %v5218_v15 }
 0xe56   :  { %5221 = vmatpush1.bf16.msra.mxu1 %v5220_v17 }
 0xe57   :  { %5223 = vmatprep.subr.bf16.mxu1 %v5222_v4 }
 0xe5a   :  { %5225 = vmatpush1.bf16.msra.mxu1 %v5224_v24 }
 0xe5b   :  { %5227 = vmatprep.subr.bf16.mxu1 %v5226_v25 }
 0xe5e   :  { %5229 = vmatpush1.bf16.msra.mxu1 %v5228_v31 }
 0xe5f   :  { %5231 = vmatprep.subr.bf16.mxu1 %v5230_v33 }
 0xe62   :  { %5233 = vmatpush1.bf16.msra.mxu1 %v5232_v35 }
 0xe63   :  { %5235 = vmatprep.subr.bf16.mxu1 %v5234_v43 }
 0xe66   :  { %5237 = vmatpush1.bf16.msra.mxu1 %v5236_v48 }
 0xe67   :  { %5239 = vmatprep.subr.bf16.mxu1 %v5238_v38 }
 0xe6a   :  { %5241 = vmatpush1.bf16.msra.mxu1 %v5240_v20 }
 0xf20   :  { %v3177_v2 = vpop.f32.mrb[26].mxu1 }
 0xf21   :  { %v3251_v34 = vmul.f32 %v3177_v2, %v3177_v2  ;;  %v4574_v37 = vpop.f32.mrb[27].mxu1 }
 0xf22   :  { %v3247_v54 = vpop.f32.mrb[32].mxu0 }
 0xf23   :  { %v3252_v57 = vsub.f32 %v3247_v54, %v3251_v34  ;;  %v4609_v56 = vpop.f32.mrb[33].mxu0 }
 0xf25   :  { %v3254_v61 = vadd.f32 1e-05, %v3252_v57 }
 0xf27   :  { %5273 = vrsqrt.f32 %v3254_v61 }
 0xf31   :  { %v5274_v3 = vpop.eup %5273 }
 0xf32   :  { %v3256_v58 = vmul.f32 %v5274_v3, %v3253_v55 }
 0xf34   :  { %v3260_v62 = vrot.slane %v3256_v58, %v5490_v52  ;;  %v3264_v63 = vmul.f32 %v3256_v58, %v3177_v2 }
 0xf36   :  { %v3261_v1 = vmul.f32 %v3260_v62, %v6405_v49  ;;  %v3265_v0 = vsub.f32 %v3263_v59, %v3264_v63  ;;  %v3262_v5 = vmul.f32 %v6401_v47, %v3260_v62  ;;  %v3459_v49 = vld [vmem:[%s6534_s1 + $0xe55] ss:$8 sm:$0x3] }
 0xf37   :  { %v3316_v47 = vrot.slane %v3459_v49, %v5490_v52  ;;  %v3320_v14 = vrot.slane %v3459_v49, %v2437_v21 }
 0xf38   :  { %v3269_v7 = vrot.slane %v3265_v0, %v5490_v52 }
 0xf3a   :  { %v3270_v60 = vadd.f32 %v3269_v7, %v3261_v1  ;;  %v3271_v8 = vadd.f32 %v3269_v7, %v3262_v5 }
 0xf3c   :  { %vm3272_vm1 = vcmp.gt.f32.partialorder %v3270_v60, 0.0  ;;  %v3274_v9 = vmul.f32 0.1, %v3270_v60  ;;  %v3275_v12 = vmul.f32 0.1, %v3271_v8  ;;  %vm3273_vm2 = vcmp.gt.f32.partialorder %v3271_v8, 0.0 }
 0xf3e   :  { %v3276_v11 = vsel %vm3272_vm1, %v3270_v60, %v3274_v9  ;;  %v3277_v13 = vsel %vm3273_vm2, %v3271_v8, %v3275_v12 }
 0xf3f   :  { %3388 = vmatmul.mubr.f32.vlgmr.msra.gmra.mrb[28].mxu1 %v3276_v11 }
 0xf40   :  { %3393 = vmatprep.mubr.f32.mxu1 %v5277_v10 }
 0xf43   :  { %3394 = vmatmul.mubr.f32.gmra.mrb[30].mxu1 %v3277_v13 }
0x1012   :  { %v3389_v15 = vpop.f32.mrb[28].mxu1 }
0x1013   :  { %v3390_v16 = vadd.f32 %v3389_v15, %v3316_v47  ;;  %v3391_v42 = vpop.f32.mrb[29].mxu1 }
0x1014   :  { %v3392_v17 = vadd.f32 %v3391_v42, %v3320_v14 }
0x1015   :  { %3400 = vst [vmem:[%s6536_s3] sm:$0xff] %v3390_v16 }
0x1016   :  { %3401 = vst.msk [vmem:[%s6536_s3 + $0x8] sm:$0xff] %vm1775_vm10, %v3392_v17  ;;  %v3395_v10 = vpop.f32.mrb[30].mxu1 }
0x1017   :  { %v3396_v18 = vadd.f32 %v3395_v10, %v3316_v47  ;;  %v3397_v19 = vpop.f32.mrb[31].mxu1 }
0x1018   :  { %v3398_v52 = vadd.f32 %v3397_v19, %v3320_v14 }
0x1019   :  { %3402 = vst [vmem:[%s6536_s3 + $0x10] sm:$0xff] %v3396_v18 }
0x101a   :  { %3403 = vst.msk [vmem:[%s6536_s3 + $0x18] sm:$0xff] %vm1775_vm10, %v3398_v52 }

</bundles_post_ra>
